<compile_context>
chip_gen: v7x
topology: tpu7x:2x2x1
jax: 0.10.0
libtpu: 0.0.40
codegen_flags: <defaults>
</compile_context>

<pallas_src>
import jax
import jax.numpy as jnp
from jax import lax
from jax.experimental import pallas as pl
from jax.experimental.pallas import tpu as pltpu

NEG_SLOPE = 0.01  # torch.nn.LeakyReLU default negative_slope


def _leaky(v):
    return jnp.where(v >= 0, v, NEG_SLOPE * v)


# ------------------------------ fused kernel --------------------------------

def _make_fused_kernel(kk2, p2):
    """Fused per-image DQN forward.

    kk2 = kh2*kw2 conv2 taps, p2 = H2*W2 conv2 output positions.
    """

    def kernel(x1g_ref, w1_ref, b1_ref, w2_ref, b2_ref,
               wd1_ref, bd1_ref, wd2_ref, bd2_ref, o_ref):
        # x1g_ref: (1, kk2, p2, K1) conv1 patches gathered under each conv2 tap
        w1 = w1_ref[...]                                      # (K1, 16)
        b1 = b1_ref[...]                                      # (1, 16)

        # conv1 GEMM + LeakyReLU fused with the conv2 tap accumulation.
        c2 = w2_ref.shape[-1]
        y2 = jnp.zeros((p2, c2), jnp.float32)                 # (p2, 32)
        for q in range(kk2):
            xq = x1g_ref[0, q]                                # (p2, K1)
            y1q = jnp.dot(xq, w1, preferred_element_type=jnp.float32) + b1
            y1q = _leaky(y1q)                                 # conv1 activation
            y2 = y2 + jnp.dot(y1q, w2_ref[q],
                              preferred_element_type=jnp.float32)
        y2 = _leaky(y2 + b2_ref[...])                         # conv2 activation

        # dense1: PyTorch NCHW flatten folded into per-position weight blocks.
        h = bd1_ref[...]                                      # (1, 256) = bias
        for p in range(p2):
            h = h + jnp.dot(y2[p:p + 1, :], wd1_ref[p],
                            preferred_element_type=jnp.float32)
        h = _leaky(h)

        # dense2 + numerically-stable softmax (reciprocal on the EUP slot).
        logits = jnp.dot(h, wd2_ref[...],
                         preferred_element_type=jnp.float32) + bd2_ref[...]
        logits = logits - jnp.max(logits, axis=-1, keepdims=True)
        e = jnp.exp(logits)
        s = jnp.sum(e, axis=-1, keepdims=True)
        o_ref[0] = e * pl.reciprocal(s, approx=True)          # (1, A)

    return kernel


# ----------------------------- wrapper helpers -------------------------------

def _conv1_patches(x_nhwc, kh, kw):
    """(N,H,W,C) -> (N, H1, W1, kh*kw*C) patches; feature order (kh, kw, c)."""
    n, h, w, c = x_nhwc.shape
    h1, w1 = h - kh + 1, w - kw + 1
    rows = jnp.stack([x_nhwc[:, i:i + h1] for i in range(kh)], axis=1)
    cols = jnp.stack([rows[:, :, :, j:j + w1] for j in range(kw)], axis=3)
    p = cols.transpose(0, 2, 4, 1, 3, 5)          # (N, H1, W1, kh, kw, C)
    return p.reshape(n, h1, w1, kh * kw * c), h1, w1


def _gather_per_tap(p1, kh2, kw2, stride):
    """For every conv2 tap (i,j) and output position, gather the conv1 patch
    sitting under that tap.  Returns (N, kh2*kw2, H2*W2, K1)."""
    n, h1, w1, k1 = p1.shape
    h2 = (h1 - kh2) // stride + 1
    w2 = (w1 - kw2) // stride + 1
    taps = []
    for i in range(kh2):
        for j in range(kw2):
            taps.append(p1[:, i:i + stride * (h2 - 1) + 1:stride,
                              j:j + stride * (w2 - 1) + 1:stride, :])
    g = jnp.stack(taps, axis=1)                   # (N, kk2, H2, W2, K1)
    return g.reshape(n, kh2 * kw2, h2 * w2, k1), h2, w2


# ------------------------------- forward pass --------------------------------

@jax.jit
def dqn_forward(params, x):
    """x: (N, C, H, W) float32 (NCHW, like the PyTorch module)."""
    n = x.shape[0]
    x_nhwc = jnp.transpose(x, (0, 2, 3, 1)).astype(jnp.float32)

    # conv1 patches (feature order (kh, kw, c)) and per-conv2-tap gather.
    p1, h1, w1 = _conv1_patches(x_nhwc, 8, 8)
    x1g, h2, w2 = _gather_per_tap(p1, 4, 4, 2)
    kk2, p2, k1 = x1g.shape[1], x1g.shape[2], x1g.shape[3]

    c_out1 = params["w1"].shape[0]                # 16
    c_out2 = params["w2"].shape[0]                # 32
    d1 = params["wd1"].shape[0]                   # 256
    a = params["wd2"].shape[0]                    # num_actions

    # Weight re-layouts (pure XLA, once per call) that preserve the PyTorch
    # OIHW / NCHW-flatten semantics while keeping activations channel-last.
    w1m = params["w1"].transpose(2, 3, 1, 0).reshape(k1, c_out1)        # (K1,16)
    w2b = params["w2"].transpose(2, 3, 1, 0).reshape(kk2, c_out1, c_out2)
    wd1b = params["wd1"].reshape(d1, c_out2, p2).transpose(2, 1, 0)     # (p2,32,256)
    wd2m = params["wd2"].T                                              # (256, A)

    kernel = _make_fused_kernel(kk2, p2)

    out = pl.pallas_call(
        kernel,
        out_shape=jax.ShapeDtypeStruct((n, 1, a), jnp.float32),
        grid=(n,),
        in_specs=[
            pl.BlockSpec((1, kk2, p2, k1), lambda i: (i, 0, 0, 0)),
            pl.BlockSpec((k1, c_out1), lambda i: (0, 0)),
            pl.BlockSpec((1, c_out1), lambda i: (0, 0)),
            pl.BlockSpec((kk2, c_out1, c_out2), lambda i: (0, 0, 0)),
            pl.BlockSpec((1, c_out2), lambda i: (0, 0)),
            pl.BlockSpec((p2, c_out2, d1), lambda i: (0, 0, 0)),
            pl.BlockSpec((1, d1), lambda i: (0, 0)),
            pl.BlockSpec((d1, a), lambda i: (0, 0)),
            pl.BlockSpec((1, a), lambda i: (0, 0)),
        ],
        out_specs=pl.BlockSpec((1, 1, a), lambda i: (i, 0, 0)),
        compiler_params=pltpu.CompilerParams(
            dimension_semantics=("parallel",)),
    )(x1g.astype(jnp.float32),
      w1m.astype(jnp.float32),
      params["b1"].reshape(1, c_out1).astype(jnp.float32),
      w2b.astype(jnp.float32),
      params["b2"].reshape(1, c_out2).astype(jnp.float32),
      wd1b.astype(jnp.float32),
      params["bd1"].reshape(1, d1).astype(jnp.float32),
      wd2m.astype(jnp.float32),
      params["bd2"].reshape(1, a).astype(jnp.float32))
    return out.reshape(n, a)


# ------------------------------ params / reference ---------------------------

def init_params(key, input_shape, num_actions):
    C, H, W = input_shape
    H1, W1 = H - 8 + 1, W - 8 + 1
    H2, W2 = (H1 - 4) // 2 + 1, (W1 - 4) // 2 + 1
    flat = 32 * H2 * W2
    ks = jax.random.split(key, 8)
    s = 0.05
    return {
        "w1": jax.random.normal(ks[0], (16, C, 8, 8), jnp.float32) * s,
        "b1": jax.random.normal(ks[1], (16,), jnp.float32) * s,
        "w2": jax.random.normal(ks[2], (32, 16, 4, 4), jnp.float32) * s,
        "b2": jax.random.normal(ks[3], (32,), jnp.float32) * s,
        "wd1": jax.random.normal(ks[4], (256, flat), jnp.float32) * s,
        "bd1": jax.random.normal(ks[5], (256,), jnp.float32) * s,
        "wd2": jax.random.normal(ks[6], (num_actions, 256), jnp.float32) * s,
        "bd2": jax.random.normal(ks[7], (num_actions,), jnp.float32) * s,
    }


def ref_forward(params, x):
    """Pure-JAX reference (same math as the PyTorch module)."""
    dn = ("NCHW", "OIHW", "NCHW")
    y = lax.conv_general_dilated(x, params["w1"], (1, 1), "VALID",
                                 dimension_numbers=dn)
    y = _leaky(y + params["b1"][None, :, None, None])
    y = lax.conv_general_dilated(y, params["w2"], (2, 2), "VALID",
                                 dimension_numbers=dn)
    y = _leaky(y + params["b2"][None, :, None, None])
    y = y.reshape(y.shape[0], -1)
    y = _leaky(y @ params["wd1"].T + params["bd1"])
    logits = y @ params["wd2"].T + params["bd2"]
    return jax.nn.softmax(logits, axis=-1)


if __name__ == "__main__":
    input_shape = (4, 16, 16)   # (C, H, W), as in the PyTorch module
    num_actions = 6
    batch = 2

    key = jax.random.PRNGKey(0)
    pkey, xkey = jax.random.split(key)
    params = init_params(pkey, input_shape, num_actions)
    x = jax.random.normal(xkey, (batch,) + input_shape, jnp.float32)

    out = jax.block_until_ready(dqn_forward(params, x))
    ref = jax.block_until_ready(ref_forward(params, x))

    assert out.shape == (batch, num_actions)
    # Tolerances are slightly relaxed vs. exact f32 division because the
    # softmax denominator uses the hardware approximate reciprocal (EUP).
    assert jnp.allclose(jnp.sum(out, axis=-1), 1.0, atol=5e-3)
    assert jnp.allclose(out, ref, atol=2e-3, rtol=2e-3)

    print("KERNEL_OK")
</pallas_src>

<mosaic_0001>
module attributes {stable_mosaic.version = 11 : i64} {
  func.func @kernel(%arg0: i32, %arg1: memref<1x16x9x256xf32, #tpu.memory_space<vmem>>, %arg2: memref<256x16xf32, #tpu.memory_space<vmem>>, %arg3: memref<1x16xf32, #tpu.memory_space<vmem>>, %arg4: memref<16x16x32xf32, #tpu.memory_space<vmem>>, %arg5: memref<1x32xf32, #tpu.memory_space<vmem>>, %arg6: memref<9x32x256xf32, #tpu.memory_space<vmem>>, %arg7: memref<1x256xf32, #tpu.memory_space<vmem>>, %arg8: memref<256x6xf32, #tpu.memory_space<vmem>>, %arg9: memref<1x6xf32, #tpu.memory_space<vmem>>, %arg10: memref<1x1x6xf32, #tpu.memory_space<vmem>>) attributes {dimension_semantics = [#tpu.dimension_semantics<parallel>], iteration_bounds = array<i64: 2>, scalar_prefetch = 0 : i64, scratch_operands = 0 : i64, tpu.core_type = #tpu.core_type<tc>, window_params = [{transform_indices = @transform_0, window_bounds = array<i64: 1, 16, 9, 256>}, {pipeline_mode = #tpu.pipeline_mode<synchronous>, transform_indices = @transform_1, window_bounds = array<i64: 256, 16>}, {pipeline_mode = #tpu.pipeline_mode<synchronous>, transform_indices = @transform_2, window_bounds = array<i64: 1, 16>}, {pipeline_mode = #tpu.pipeline_mode<synchronous>, transform_indices = @transform_3, window_bounds = array<i64: 16, 16, 32>}, {pipeline_mode = #tpu.pipeline_mode<synchronous>, transform_indices = @transform_4, window_bounds = array<i64: 1, 32>}, {pipeline_mode = #tpu.pipeline_mode<synchronous>, transform_indices = @transform_5, window_bounds = array<i64: 9, 32, 256>}, {pipeline_mode = #tpu.pipeline_mode<synchronous>, transform_indices = @transform_6, window_bounds = array<i64: 1, 256>}, {pipeline_mode = #tpu.pipeline_mode<synchronous>, transform_indices = @transform_7, window_bounds = array<i64: 256, 6>}, {pipeline_mode = #tpu.pipeline_mode<synchronous>, transform_indices = @transform_8, window_bounds = array<i64: 1, 6>}, {transform_indices = @transform_9, window_bounds = array<i64: 1, 1, 6>}]} {
    %c0 = arith.constant 0 : index
    %c0_0 = arith.constant 0 : index
    %0 = vector.load %arg2[%c0, %c0_0] : memref<256x16xf32, #tpu.memory_space<vmem>>, vector<256x16xf32>
    %c0_1 = arith.constant 0 : index
    %c0_2 = arith.constant 0 : index
    %1 = vector.load %arg3[%c0_1, %c0_2] : memref<1x16xf32, #tpu.memory_space<vmem>>, vector<1x16xf32>
    %cst = arith.constant 0.000000e+00 : f32
    %2 = vector.broadcast %cst : f32 to vector<9x32xf32>
    %c0_3 = arith.constant 0 : index
    %c0_4 = arith.constant 0 : index
    %c0_5 = arith.constant 0 : index
    %c0_6 = arith.constant 0 : index
    %3 = vector.load %arg1[%c0_3, %c0_4, %c0_5, %c0_6] : memref<1x16x9x256xf32, #tpu.memory_space<vmem>>, vector<1x1x9x256xf32>
    %4 = vector.shape_cast %3 : vector<1x1x9x256xf32> to vector<9x256xf32>
    %cst_7 = arith.constant dense<0.000000e+00> : vector<9x16xf32>
    %5 = tpu.matmul %4, %0, %cst_7 {dimension_numbers = #tpu.dot_dimension_numbers<[1], [0], [0], [1], [0, 0, 1, 1], [], []>} : vector<9x256xf32>, vector<256x16xf32>, vector<9x16xf32> -> vector<9x16xf32>
    %6 = vector.broadcast %1 : vector<1x16xf32> to vector<9x16xf32>
    %7 = arith.addf %5, %6 : vector<9x16xf32>
    %cst_8 = arith.constant 0.000000e+00 : f32
    %8 = vector.broadcast %cst_8 : f32 to vector<9x16xf32>
    %9 = arith.cmpf oge, %7, %8 : vector<9x16xf32>
    %cst_9 = arith.constant 0.00999999977 : f32
    %10 = vector.broadcast %cst_9 : f32 to vector<9x16xf32>
    %11 = arith.mulf %10, %7 : vector<9x16xf32>
    %12 = arith.select %9, %7, %11 : vector<9x16xi1>, vector<9x16xf32>
    %c0_10 = arith.constant 0 : index
    %c0_11 = arith.constant 0 : index
    %c0_12 = arith.constant 0 : index
    %13 = vector.load %arg4[%c0_10, %c0_11, %c0_12] : memref<16x16x32xf32, #tpu.memory_space<vmem>>, vector<1x16x32xf32>
    %14 = vector.shape_cast %13 : vector<1x16x32xf32> to vector<16x32xf32>
    %cst_13 = arith.constant dense<0.000000e+00> : vector<9x32xf32>
    %15 = tpu.matmul %12, %14, %cst_13 {dimension_numbers = #tpu.dot_dimension_numbers<[1], [0], [0], [1], [0, 0, 1, 1], [], []>} : vector<9x16xf32>, vector<16x32xf32>, vector<9x32xf32> -> vector<9x32xf32>
    %16 = arith.addf %2, %15 : vector<9x32xf32>
    %c0_14 = arith.constant 0 : index
    %c1 = arith.constant 1 : index
    %c0_15 = arith.constant 0 : index
    %c0_16 = arith.constant 0 : index
    %17 = vector.load %arg1[%c0_14, %c1, %c0_15, %c0_16] : memref<1x16x9x256xf32, #tpu.memory_space<vmem>>, vector<1x1x9x256xf32>
    %18 = vector.shape_cast %17 : vector<1x1x9x256xf32> to vector<9x256xf32>
    %cst_17 = arith.constant dense<0.000000e+00> : vector<9x16xf32>
    %19 = tpu.matmul %18, %0, %cst_17 {dimension_numbers = #tpu.dot_dimension_numbers<[1], [0], [0], [1], [0, 0, 1, 1], [], []>} : vector<9x256xf32>, vector<256x16xf32>, vector<9x16xf32> -> vector<9x16xf32>
    %20 = vector.broadcast %1 : vector<1x16xf32> to vector<9x16xf32>
    %21 = arith.addf %19, %20 : vector<9x16xf32>
    %cst_18 = arith.constant 0.000000e+00 : f32
    %22 = vector.broadcast %cst_18 : f32 to vector<9x16xf32>
    %23 = arith.cmpf oge, %21, %22 : vector<9x16xf32>
    %cst_19 = arith.constant 0.00999999977 : f32
    %24 = vector.broadcast %cst_19 : f32 to vector<9x16xf32>
    %25 = arith.mulf %24, %21 : vector<9x16xf32>
    %26 = arith.select %23, %21, %25 : vector<9x16xi1>, vector<9x16xf32>
    %c1_20 = arith.constant 1 : index
    %c0_21 = arith.constant 0 : index
    %c0_22 = arith.constant 0 : index
    %27 = vector.load %arg4[%c1_20, %c0_21, %c0_22] : memref<16x16x32xf32, #tpu.memory_space<vmem>>, vector<1x16x32xf32>
    %28 = vector.shape_cast %27 : vector<1x16x32xf32> to vector<16x32xf32>
    %cst_23 = arith.constant dense<0.000000e+00> : vector<9x32xf32>
    %29 = tpu.matmul %26, %28, %cst_23 {dimension_numbers = #tpu.dot_dimension_numbers<[1], [0], [0], [1], [0, 0, 1, 1], [], []>} : vector<9x16xf32>, vector<16x32xf32>, vector<9x32xf32> -> vector<9x32xf32>
    %30 = arith.addf %16, %29 : vector<9x32xf32>
    %c0_24 = arith.constant 0 : index
    %c2 = arith.constant 2 : index
    %c0_25 = arith.constant 0 : index
    %c0_26 = arith.constant 0 : index
    %31 = vector.load %arg1[%c0_24, %c2, %c0_25, %c0_26] : memref<1x16x9x256xf32, #tpu.memory_space<vmem>>, vector<1x1x9x256xf32>
    %32 = vector.shape_cast %31 : vector<1x1x9x256xf32> to vector<9x256xf32>
    %cst_27 = arith.constant dense<0.000000e+00> : vector<9x16xf32>
    %33 = tpu.matmul %32, %0, %cst_27 {dimension_numbers = #tpu.dot_dimension_numbers<[1], [0], [0], [1], [0, 0, 1, 1], [], []>} : vector<9x256xf32>, vector<256x16xf32>, vector<9x16xf32> -> vector<9x16xf32>
    %34 = vector.broadcast %1 : vector<1x16xf32> to vector<9x16xf32>
    %35 = arith.addf %33, %34 : vector<9x16xf32>
    %cst_28 = arith.constant 0.000000e+00 : f32
    %36 = vector.broadcast %cst_28 : f32 to vector<9x16xf32>
    %37 = arith.cmpf oge, %35, %36 : vector<9x16xf32>
    %cst_29 = arith.constant 0.00999999977 : f32
    %38 = vector.broadcast %cst_29 : f32 to vector<9x16xf32>
    %39 = arith.mulf %38, %35 : vector<9x16xf32>
    %40 = arith.select %37, %35, %39 : vector<9x16xi1>, vector<9x16xf32>
    %c2_30 = arith.constant 2 : index
    %c0_31 = arith.constant 0 : index
    %c0_32 = arith.constant 0 : index
    %41 = vector.load %arg4[%c2_30, %c0_31, %c0_32] : memref<16x16x32xf32, #tpu.memory_space<vmem>>, vector<1x16x32xf32>
    %42 = vector.shape_cast %41 : vector<1x16x32xf32> to vector<16x32xf32>
    %cst_33 = arith.constant dense<0.000000e+00> : vector<9x32xf32>
    %43 = tpu.matmul %40, %42, %cst_33 {dimension_numbers = #tpu.dot_dimension_numbers<[1], [0], [0], [1], [0, 0, 1, 1], [], []>} : vector<9x16xf32>, vector<16x32xf32>, vector<9x32xf32> -> vector<9x32xf32>
    %44 = arith.addf %30, %43 : vector<9x32xf32>
    %c0_34 = arith.constant 0 : index
    %c3 = arith.constant 3 : index
    %c0_35 = arith.constant 0 : index
    %c0_36 = arith.constant 0 : index
    %45 = vector.load %arg1[%c0_34, %c3, %c0_35, %c0_36] : memref<1x16x9x256xf32, #tpu.memory_space<vmem>>, vector<1x1x9x256xf32>
    %46 = vector.shape_cast %45 : vector<1x1x9x256xf32> to vector<9x256xf32>
    %cst_37 = arith.constant dense<0.000000e+00> : vector<9x16xf32>
    %47 = tpu.matmul %46, %0, %cst_37 {dimension_numbers = #tpu.dot_dimension_numbers<[1], [0], [0], [1], [0, 0, 1, 1], [], []>} : vector<9x256xf32>, vector<256x16xf32>, vector<9x16xf32> -> vector<9x16xf32>
    %48 = vector.broadcast %1 : vector<1x16xf32> to vector<9x16xf32>
    %49 = arith.addf %47, %48 : vector<9x16xf32>
    %cst_38 = arith.constant 0.000000e+00 : f32
    %50 = vector.broadcast %cst_38 : f32 to vector<9x16xf32>
    %51 = arith.cmpf oge, %49, %50 : vector<9x16xf32>
    %cst_39 = arith.constant 0.00999999977 : f32
    %52 = vector.broadcast %cst_39 : f32 to vector<9x16xf32>
    %53 = arith.mulf %52, %49 : vector<9x16xf32>
    %54 = arith.select %51, %49, %53 : vector<9x16xi1>, vector<9x16xf32>
    %c3_40 = arith.constant 3 : index
    %c0_41 = arith.constant 0 : index
    %c0_42 = arith.constant 0 : index
    %55 = vector.load %arg4[%c3_40, %c0_41, %c0_42] : memref<16x16x32xf32, #tpu.memory_space<vmem>>, vector<1x16x32xf32>
    %56 = vector.shape_cast %55 : vector<1x16x32xf32> to vector<16x32xf32>
    %cst_43 = arith.constant dense<0.000000e+00> : vector<9x32xf32>
    %57 = tpu.matmul %54, %56, %cst_43 {dimension_numbers = #tpu.dot_dimension_numbers<[1], [0], [0], [1], [0, 0, 1, 1], [], []>} : vector<9x16xf32>, vector<16x32xf32>, vector<9x32xf32> -> vector<9x32xf32>
    %58 = arith.addf %44, %57 : vector<9x32xf32>
    %c0_44 = arith.constant 0 : index
    %c4 = arith.constant 4 : index
    %c0_45 = arith.constant 0 : index
    %c0_46 = arith.constant 0 : index
    %59 = vector.load %arg1[%c0_44, %c4, %c0_45, %c0_46] : memref<1x16x9x256xf32, #tpu.memory_space<vmem>>, vector<1x1x9x256xf32>
    %60 = vector.shape_cast %59 : vector<1x1x9x256xf32> to vector<9x256xf32>
    %cst_47 = arith.constant dense<0.000000e+00> : vector<9x16xf32>
    %61 = tpu.matmul %60, %0, %cst_47 {dimension_numbers = #tpu.dot_dimension_numbers<[1], [0], [0], [1], [0, 0, 1, 1], [], []>} : vector<9x256xf32>, vector<256x16xf32>, vector<9x16xf32> -> vector<9x16xf32>
    %62 = vector.broadcast %1 : vector<1x16xf32> to vector<9x16xf32>
    %63 = arith.addf %61, %62 : vector<9x16xf32>
    %cst_48 = arith.constant 0.000000e+00 : f32
    %64 = vector.broadcast %cst_48 : f32 to vector<9x16xf32>
    %65 = arith.cmpf oge, %63, %64 : vector<9x16xf32>
    %cst_49 = arith.constant 0.00999999977 : f32
    %66 = vector.broadcast %cst_49 : f32 to vector<9x16xf32>
    %67 = arith.mulf %66, %63 : vector<9x16xf32>
    %68 = arith.select %65, %63, %67 : vector<9x16xi1>, vector<9x16xf32>
    %c4_50 = arith.constant 4 : index
    %c0_51 = arith.constant 0 : index
    %c0_52 = arith.constant 0 : index
    %69 = vector.load %arg4[%c4_50, %c0_51, %c0_52] : memref<16x16x32xf32, #tpu.memory_space<vmem>>, vector<1x16x32xf32>
    %70 = vector.shape_cast %69 : vector<1x16x32xf32> to vector<16x32xf32>
    %cst_53 = arith.constant dense<0.000000e+00> : vector<9x32xf32>
    %71 = tpu.matmul %68, %70, %cst_53 {dimension_numbers = #tpu.dot_dimension_numbers<[1], [0], [0], [1], [0, 0, 1, 1], [], []>} : vector<9x16xf32>, vector<16x32xf32>, vector<9x32xf32> -> vector<9x32xf32>
    %72 = arith.addf %58, %71 : vector<9x32xf32>
    %c0_54 = arith.constant 0 : index
    %c5 = arith.constant 5 : index
    %c0_55 = arith.constant 0 : index
    %c0_56 = arith.constant 0 : index
    %73 = vector.load %arg1[%c0_54, %c5, %c0_55, %c0_56] : memref<1x16x9x256xf32, #tpu.memory_space<vmem>>, vector<1x1x9x256xf32>
    %74 = vector.shape_cast %73 : vector<1x1x9x256xf32> to vector<9x256xf32>
    %cst_57 = arith.constant dense<0.000000e+00> : vector<9x16xf32>
    %75 = tpu.matmul %74, %0, %cst_57 {dimension_numbers = #tpu.dot_dimension_numbers<[1], [0], [0], [1], [0, 0, 1, 1], [], []>} : vector<9x256xf32>, vector<256x16xf32>, vector<9x16xf32> -> vector<9x16xf32>
    %76 = vector.broadcast %1 : vector<1x16xf32> to vector<9x16xf32>
    %77 = arith.addf %75, %76 : vector<9x16xf32>
    %cst_58 = arith.constant 0.000000e+00 : f32
    %78 = vector.broadcast %cst_58 : f32 to vector<9x16xf32>
    %79 = arith.cmpf oge, %77, %78 : vector<9x16xf32>
    %cst_59 = arith.constant 0.00999999977 : f32
    %80 = vector.broadcast %cst_59 : f32 to vector<9x16xf32>
    %81 = arith.mulf %80, %77 : vector<9x16xf32>
    %82 = arith.select %79, %77, %81 : vector<9x16xi1>, vector<9x16xf32>
    %c5_60 = arith.constant 5 : index
    %c0_61 = arith.constant 0 : index
    %c0_62 = arith.constant 0 : index
    %83 = vector.load %arg4[%c5_60, %c0_61, %c0_62] : memref<16x16x32xf32, #tpu.memory_space<vmem>>, vector<1x16x32xf32>
    %84 = vector.shape_cast %83 : vector<1x16x32xf32> to vector<16x32xf32>
    %cst_63 = arith.constant dense<0.000000e+00> : vector<9x32xf32>
    %85 = tpu.matmul %82, %84, %cst_63 {dimension_numbers = #tpu.dot_dimension_numbers<[1], [0], [0], [1], [0, 0, 1, 1], [], []>} : vector<9x16xf32>, vector<16x32xf32>, vector<9x32xf32> -> vector<9x32xf32>
    %86 = arith.addf %72, %85 : vector<9x32xf32>
    %c0_64 = arith.constant 0 : index
    %c6 = arith.constant 6 : index
    %c0_65 = arith.constant 0 : index
    %c0_66 = arith.constant 0 : index
    %87 = vector.load %arg1[%c0_64, %c6, %c0_65, %c0_66] : memref<1x16x9x256xf32, #tpu.memory_space<vmem>>, vector<1x1x9x256xf32>
    %88 = vector.shape_cast %87 : vector<1x1x9x256xf32> to vector<9x256xf32>
    %cst_67 = arith.constant dense<0.000000e+00> : vector<9x16xf32>
    %89 = tpu.matmul %88, %0, %cst_67 {dimension_numbers = #tpu.dot_dimension_numbers<[1], [0], [0], [1], [0, 0, 1, 1], [], []>} : vector<9x256xf32>, vector<256x16xf32>, vector<9x16xf32> -> vector<9x16xf32>
    %90 = vector.broadcast %1 : vector<1x16xf32> to vector<9x16xf32>
    %91 = arith.addf %89, %90 : vector<9x16xf32>
    %cst_68 = arith.constant 0.000000e+00 : f32
    %92 = vector.broadcast %cst_68 : f32 to vector<9x16xf32>
    %93 = arith.cmpf oge, %91, %92 : vector<9x16xf32>
    %cst_69 = arith.constant 0.00999999977 : f32
    %94 = vector.broadcast %cst_69 : f32 to vector<9x16xf32>
    %95 = arith.mulf %94, %91 : vector<9x16xf32>
    %96 = arith.select %93, %91, %95 : vector<9x16xi1>, vector<9x16xf32>
    %c6_70 = arith.constant 6 : index
    %c0_71 = arith.constant 0 : index
    %c0_72 = arith.constant 0 : index
    %97 = vector.load %arg4[%c6_70, %c0_71, %c0_72] : memref<16x16x32xf32, #tpu.memory_space<vmem>>, vector<1x16x32xf32>
    %98 = vector.shape_cast %97 : vector<1x16x32xf32> to vector<16x32xf32>
    %cst_73 = arith.constant dense<0.000000e+00> : vector<9x32xf32>
    %99 = tpu.matmul %96, %98, %cst_73 {dimension_numbers = #tpu.dot_dimension_numbers<[1], [0], [0], [1], [0, 0, 1, 1], [], []>} : vector<9x16xf32>, vector<16x32xf32>, vector<9x32xf32> -> vector<9x32xf32>
    %100 = arith.addf %86, %99 : vector<9x32xf32>
    %c0_74 = arith.constant 0 : index
    %c7 = arith.constant 7 : index
    %c0_75 = arith.constant 0 : index
    %c0_76 = arith.constant 0 : index
    %101 = vector.load %arg1[%c0_74, %c7, %c0_75, %c0_76] : memref<1x16x9x256xf32, #tpu.memory_space<vmem>>, vector<1x1x9x256xf32>
    %102 = vector.shape_cast %101 : vector<1x1x9x256xf32> to vector<9x256xf32>
    %cst_77 = arith.constant dense<0.000000e+00> : vector<9x16xf32>
    %103 = tpu.matmul %102, %0, %cst_77 {dimension_numbers = #tpu.dot_dimension_numbers<[1], [0], [0], [1], [0, 0, 1, 1], [], []>} : vector<9x256xf32>, vector<256x16xf32>, vector<9x16xf32> -> vector<9x16xf32>
    %104 = vector.broadcast %1 : vector<1x16xf32> to vector<9x16xf32>
    %105 = arith.addf %103, %104 : vector<9x16xf32>
    %cst_78 = arith.constant 0.000000e+00 : f32
    %106 = vector.broadcast %cst_78 : f32 to vector<9x16xf32>
    %107 = arith.cmpf oge, %105, %106 : vector<9x16xf32>
    %cst_79 = arith.constant 0.00999999977 : f32
    %108 = vector.broadcast %cst_79 : f32 to vector<9x16xf32>
    %109 = arith.mulf %108, %105 : vector<9x16xf32>
    %110 = arith.select %107, %105, %109 : vector<9x16xi1>, vector<9x16xf32>
    %c7_80 = arith.constant 7 : index
    %c0_81 = arith.constant 0 : index
    %c0_82 = arith.constant 0 : index
    %111 = vector.load %arg4[%c7_80, %c0_81, %c0_82] : memref<16x16x32xf32, #tpu.memory_space<vmem>>, vector<1x16x32xf32>
    %112 = vector.shape_cast %111 : vector<1x16x32xf32> to vector<16x32xf32>
    %cst_83 = arith.constant dense<0.000000e+00> : vector<9x32xf32>
    %113 = tpu.matmul %110, %112, %cst_83 {dimension_numbers = #tpu.dot_dimension_numbers<[1], [0], [0], [1], [0, 0, 1, 1], [], []>} : vector<9x16xf32>, vector<16x32xf32>, vector<9x32xf32> -> vector<9x32xf32>
    %114 = arith.addf %100, %113 : vector<9x32xf32>
    %c0_84 = arith.constant 0 : index
    %c8 = arith.constant 8 : index
    %c0_85 = arith.constant 0 : index
    %c0_86 = arith.constant 0 : index
    %115 = vector.load %arg1[%c0_84, %c8, %c0_85, %c0_86] : memref<1x16x9x256xf32, #tpu.memory_space<vmem>>, vector<1x1x9x256xf32>
    %116 = vector.shape_cast %115 : vector<1x1x9x256xf32> to vector<9x256xf32>
    %cst_87 = arith.constant dense<0.000000e+00> : vector<9x16xf32>
    %117 = tpu.matmul %116, %0, %cst_87 {dimension_numbers = #tpu.dot_dimension_numbers<[1], [0], [0], [1], [0, 0, 1, 1], [], []>} : vector<9x256xf32>, vector<256x16xf32>, vector<9x16xf32> -> vector<9x16xf32>
    %118 = vector.broadcast %1 : vector<1x16xf32> to vector<9x16xf32>
    %119 = arith.addf %117, %118 : vector<9x16xf32>
    %cst_88 = arith.constant 0.000000e+00 : f32
    %120 = vector.broadcast %cst_88 : f32 to vector<9x16xf32>
    %121 = arith.cmpf oge, %119, %120 : vector<9x16xf32>
    %cst_89 = arith.constant 0.00999999977 : f32
    %122 = vector.broadcast %cst_89 : f32 to vector<9x16xf32>
    %123 = arith.mulf %122, %119 : vector<9x16xf32>
    %124 = arith.select %121, %119, %123 : vector<9x16xi1>, vector<9x16xf32>
    %c8_90 = arith.constant 8 : index
    %c0_91 = arith.constant 0 : index
    %c0_92 = arith.constant 0 : index
    %125 = vector.load %arg4[%c8_90, %c0_91, %c0_92] : memref<16x16x32xf32, #tpu.memory_space<vmem>>, vector<1x16x32xf32>
    %126 = vector.shape_cast %125 : vector<1x16x32xf32> to vector<16x32xf32>
    %cst_93 = arith.constant dense<0.000000e+00> : vector<9x32xf32>
    %127 = tpu.matmul %124, %126, %cst_93 {dimension_numbers = #tpu.dot_dimension_numbers<[1], [0], [0], [1], [0, 0, 1, 1], [], []>} : vector<9x16xf32>, vector<16x32xf32>, vector<9x32xf32> -> vector<9x32xf32>
    %128 = arith.addf %114, %127 : vector<9x32xf32>
    %c0_94 = arith.constant 0 : index
    %c9 = arith.constant 9 : index
    %c0_95 = arith.constant 0 : index
    %c0_96 = arith.constant 0 : index
    %129 = vector.load %arg1[%c0_94, %c9, %c0_95, %c0_96] : memref<1x16x9x256xf32, #tpu.memory_space<vmem>>, vector<1x1x9x256xf32>
    %130 = vector.shape_cast %129 : vector<1x1x9x256xf32> to vector<9x256xf32>
    %cst_97 = arith.constant dense<0.000000e+00> : vector<9x16xf32>
    %131 = tpu.matmul %130, %0, %cst_97 {dimension_numbers = #tpu.dot_dimension_numbers<[1], [0], [0], [1], [0, 0, 1, 1], [], []>} : vector<9x256xf32>, vector<256x16xf32>, vector<9x16xf32> -> vector<9x16xf32>
    %132 = vector.broadcast %1 : vector<1x16xf32> to vector<9x16xf32>
    %133 = arith.addf %131, %132 : vector<9x16xf32>
    %cst_98 = arith.constant 0.000000e+00 : f32
    %134 = vector.broadcast %cst_98 : f32 to vector<9x16xf32>
    %135 = arith.cmpf oge, %133, %134 : vector<9x16xf32>
    %cst_99 = arith.constant 0.00999999977 : f32
    %136 = vector.broadcast %cst_99 : f32 to vector<9x16xf32>
    %137 = arith.mulf %136, %133 : vector<9x16xf32>
    %138 = arith.select %135, %133, %137 : vector<9x16xi1>, vector<9x16xf32>
    %c9_100 = arith.constant 9 : index
    %c0_101 = arith.constant 0 : index
    %c0_102 = arith.constant 0 : index
    %139 = vector.load %arg4[%c9_100, %c0_101, %c0_102] : memref<16x16x32xf32, #tpu.memory_space<vmem>>, vector<1x16x32xf32>
    %140 = vector.shape_cast %139 : vector<1x16x32xf32> to vector<16x32xf32>
    %cst_103 = arith.constant dense<0.000000e+00> : vector<9x32xf32>
    %141 = tpu.matmul %138, %140, %cst_103 {dimension_numbers = #tpu.dot_dimension_numbers<[1], [0], [0], [1], [0, 0, 1, 1], [], []>} : vector<9x16xf32>, vector<16x32xf32>, vector<9x32xf32> -> vector<9x32xf32>
    %142 = arith.addf %128, %141 : vector<9x32xf32>
    %c0_104 = arith.constant 0 : index
    %c10 = arith.constant 10 : index
    %c0_105 = arith.constant 0 : index
    %c0_106 = arith.constant 0 : index
    %143 = vector.load %arg1[%c0_104, %c10, %c0_105, %c0_106] : memref<1x16x9x256xf32, #tpu.memory_space<vmem>>, vector<1x1x9x256xf32>
    %144 = vector.shape_cast %143 : vector<1x1x9x256xf32> to vector<9x256xf32>
    %cst_107 = arith.constant dense<0.000000e+00> : vector<9x16xf32>
    %145 = tpu.matmul %144, %0, %cst_107 {dimension_numbers = #tpu.dot_dimension_numbers<[1], [0], [0], [1], [0, 0, 1, 1], [], []>} : vector<9x256xf32>, vector<256x16xf32>, vector<9x16xf32> -> vector<9x16xf32>
    %146 = vector.broadcast %1 : vector<1x16xf32> to vector<9x16xf32>
    %147 = arith.addf %145, %146 : vector<9x16xf32>
    %cst_108 = arith.constant 0.000000e+00 : f32
    %148 = vector.broadcast %cst_108 : f32 to vector<9x16xf32>
    %149 = arith.cmpf oge, %147, %148 : vector<9x16xf32>
    %cst_109 = arith.constant 0.00999999977 : f32
    %150 = vector.broadcast %cst_109 : f32 to vector<9x16xf32>
    %151 = arith.mulf %150, %147 : vector<9x16xf32>
    %152 = arith.select %149, %147, %151 : vector<9x16xi1>, vector<9x16xf32>
    %c10_110 = arith.constant 10 : index
    %c0_111 = arith.constant 0 : index
    %c0_112 = arith.constant 0 : index
    %153 = vector.load %arg4[%c10_110, %c0_111, %c0_112] : memref<16x16x32xf32, #tpu.memory_space<vmem>>, vector<1x16x32xf32>
    %154 = vector.shape_cast %153 : vector<1x16x32xf32> to vector<16x32xf32>
    %cst_113 = arith.constant dense<0.000000e+00> : vector<9x32xf32>
    %155 = tpu.matmul %152, %154, %cst_113 {dimension_numbers = #tpu.dot_dimension_numbers<[1], [0], [0], [1], [0, 0, 1, 1], [], []>} : vector<9x16xf32>, vector<16x32xf32>, vector<9x32xf32> -> vector<9x32xf32>
    %156 = arith.addf %142, %155 : vector<9x32xf32>
    %c0_114 = arith.constant 0 : index
    %c11 = arith.constant 11 : index
    %c0_115 = arith.constant 0 : index
    %c0_116 = arith.constant 0 : index
    %157 = vector.load %arg1[%c0_114, %c11, %c0_115, %c0_116] : memref<1x16x9x256xf32, #tpu.memory_space<vmem>>, vector<1x1x9x256xf32>
    %158 = vector.shape_cast %157 : vector<1x1x9x256xf32> to vector<9x256xf32>
    %cst_117 = arith.constant dense<0.000000e+00> : vector<9x16xf32>
    %159 = tpu.matmul %158, %0, %cst_117 {dimension_numbers = #tpu.dot_dimension_numbers<[1], [0], [0], [1], [0, 0, 1, 1], [], []>} : vector<9x256xf32>, vector<256x16xf32>, vector<9x16xf32> -> vector<9x16xf32>
    %160 = vector.broadcast %1 : vector<1x16xf32> to vector<9x16xf32>
    %161 = arith.addf %159, %160 : vector<9x16xf32>
    %cst_118 = arith.constant 0.000000e+00 : f32
    %162 = vector.broadcast %cst_118 : f32 to vector<9x16xf32>
    %163 = arith.cmpf oge, %161, %162 : vector<9x16xf32>
    %cst_119 = arith.constant 0.00999999977 : f32
    %164 = vector.broadcast %cst_119 : f32 to vector<9x16xf32>
    %165 = arith.mulf %164, %161 : vector<9x16xf32>
    %166 = arith.select %163, %161, %165 : vector<9x16xi1>, vector<9x16xf32>
    %c11_120 = arith.constant 11 : index
    %c0_121 = arith.constant 0 : index
    %c0_122 = arith.constant 0 : index
    %167 = vector.load %arg4[%c11_120, %c0_121, %c0_122] : memref<16x16x32xf32, #tpu.memory_space<vmem>>, vector<1x16x32xf32>
    %168 = vector.shape_cast %167 : vector<1x16x32xf32> to vector<16x32xf32>
    %cst_123 = arith.constant dense<0.000000e+00> : vector<9x32xf32>
    %169 = tpu.matmul %166, %168, %cst_123 {dimension_numbers = #tpu.dot_dimension_numbers<[1], [0], [0], [1], [0, 0, 1, 1], [], []>} : vector<9x16xf32>, vector<16x32xf32>, vector<9x32xf32> -> vector<9x32xf32>
    %170 = arith.addf %156, %169 : vector<9x32xf32>
    %c0_124 = arith.constant 0 : index
    %c12 = arith.constant 12 : index
    %c0_125 = arith.constant 0 : index
    %c0_126 = arith.constant 0 : index
    %171 = vector.load %arg1[%c0_124, %c12, %c0_125, %c0_126] : memref<1x16x9x256xf32, #tpu.memory_space<vmem>>, vector<1x1x9x256xf32>
    %172 = vector.shape_cast %171 : vector<1x1x9x256xf32> to vector<9x256xf32>
    %cst_127 = arith.constant dense<0.000000e+00> : vector<9x16xf32>
    %173 = tpu.matmul %172, %0, %cst_127 {dimension_numbers = #tpu.dot_dimension_numbers<[1], [0], [0], [1], [0, 0, 1, 1], [], []>} : vector<9x256xf32>, vector<256x16xf32>, vector<9x16xf32> -> vector<9x16xf32>
    %174 = vector.broadcast %1 : vector<1x16xf32> to vector<9x16xf32>
    %175 = arith.addf %173, %174 : vector<9x16xf32>
    %cst_128 = arith.constant 0.000000e+00 : f32
    %176 = vector.broadcast %cst_128 : f32 to vector<9x16xf32>
    %177 = arith.cmpf oge, %175, %176 : vector<9x16xf32>
    %cst_129 = arith.constant 0.00999999977 : f32
    %178 = vector.broadcast %cst_129 : f32 to vector<9x16xf32>
    %179 = arith.mulf %178, %175 : vector<9x16xf32>
    %180 = arith.select %177, %175, %179 : vector<9x16xi1>, vector<9x16xf32>
    %c12_130 = arith.constant 12 : index
    %c0_131 = arith.constant 0 : index
    %c0_132 = arith.constant 0 : index
    %181 = vector.load %arg4[%c12_130, %c0_131, %c0_132] : memref<16x16x32xf32, #tpu.memory_space<vmem>>, vector<1x16x32xf32>
    %182 = vector.shape_cast %181 : vector<1x16x32xf32> to vector<16x32xf32>
    %cst_133 = arith.constant dense<0.000000e+00> : vector<9x32xf32>
    %183 = tpu.matmul %180, %182, %cst_133 {dimension_numbers = #tpu.dot_dimension_numbers<[1], [0], [0], [1], [0, 0, 1, 1], [], []>} : vector<9x16xf32>, vector<16x32xf32>, vector<9x32xf32> -> vector<9x32xf32>
    %184 = arith.addf %170, %183 : vector<9x32xf32>
    %c0_134 = arith.constant 0 : index
    %c13 = arith.constant 13 : index
    %c0_135 = arith.constant 0 : index
    %c0_136 = arith.constant 0 : index
    %185 = vector.load %arg1[%c0_134, %c13, %c0_135, %c0_136] : memref<1x16x9x256xf32, #tpu.memory_space<vmem>>, vector<1x1x9x256xf32>
    %186 = vector.shape_cast %185 : vector<1x1x9x256xf32> to vector<9x256xf32>
    %cst_137 = arith.constant dense<0.000000e+00> : vector<9x16xf32>
    %187 = tpu.matmul %186, %0, %cst_137 {dimension_numbers = #tpu.dot_dimension_numbers<[1], [0], [0], [1], [0, 0, 1, 1], [], []>} : vector<9x256xf32>, vector<256x16xf32>, vector<9x16xf32> -> vector<9x16xf32>
    %188 = vector.broadcast %1 : vector<1x16xf32> to vector<9x16xf32>
    %189 = arith.addf %187, %188 : vector<9x16xf32>
    %cst_138 = arith.constant 0.000000e+00 : f32
    %190 = vector.broadcast %cst_138 : f32 to vector<9x16xf32>
    %191 = arith.cmpf oge, %189, %190 : vector<9x16xf32>
    %cst_139 = arith.constant 0.00999999977 : f32
    %192 = vector.broadcast %cst_139 : f32 to vector<9x16xf32>
    %193 = arith.mulf %192, %189 : vector<9x16xf32>
    %194 = arith.select %191, %189, %193 : vector<9x16xi1>, vector<9x16xf32>
    %c13_140 = arith.constant 13 : index
    %c0_141 = arith.constant 0 : index
    %c0_142 = arith.constant 0 : index
    %195 = vector.load %arg4[%c13_140, %c0_141, %c0_142] : memref<16x16x32xf32, #tpu.memory_space<vmem>>, vector<1x16x32xf32>
    %196 = vector.shape_cast %195 : vector<1x16x32xf32> to vector<16x32xf32>
    %cst_143 = arith.constant dense<0.000000e+00> : vector<9x32xf32>
    %197 = tpu.matmul %194, %196, %cst_143 {dimension_numbers = #tpu.dot_dimension_numbers<[1], [0], [0], [1], [0, 0, 1, 1], [], []>} : vector<9x16xf32>, vector<16x32xf32>, vector<9x32xf32> -> vector<9x32xf32>
    %198 = arith.addf %184, %197 : vector<9x32xf32>
    %c0_144 = arith.constant 0 : index
    %c14 = arith.constant 14 : index
    %c0_145 = arith.constant 0 : index
    %c0_146 = arith.constant 0 : index
    %199 = vector.load %arg1[%c0_144, %c14, %c0_145, %c0_146] : memref<1x16x9x256xf32, #tpu.memory_space<vmem>>, vector<1x1x9x256xf32>
    %200 = vector.shape_cast %199 : vector<1x1x9x256xf32> to vector<9x256xf32>
    %cst_147 = arith.constant dense<0.000000e+00> : vector<9x16xf32>
    %201 = tpu.matmul %200, %0, %cst_147 {dimension_numbers = #tpu.dot_dimension_numbers<[1], [0], [0], [1], [0, 0, 1, 1], [], []>} : vector<9x256xf32>, vector<256x16xf32>, vector<9x16xf32> -> vector<9x16xf32>
    %202 = vector.broadcast %1 : vector<1x16xf32> to vector<9x16xf32>
    %203 = arith.addf %201, %202 : vector<9x16xf32>
    %cst_148 = arith.constant 0.000000e+00 : f32
    %204 = vector.broadcast %cst_148 : f32 to vector<9x16xf32>
    %205 = arith.cmpf oge, %203, %204 : vector<9x16xf32>
    %cst_149 = arith.constant 0.00999999977 : f32
    %206 = vector.broadcast %cst_149 : f32 to vector<9x16xf32>
    %207 = arith.mulf %206, %203 : vector<9x16xf32>
    %208 = arith.select %205, %203, %207 : vector<9x16xi1>, vector<9x16xf32>
    %c14_150 = arith.constant 14 : index
    %c0_151 = arith.constant 0 : index
    %c0_152 = arith.constant 0 : index
    %209 = vector.load %arg4[%c14_150, %c0_151, %c0_152] : memref<16x16x32xf32, #tpu.memory_space<vmem>>, vector<1x16x32xf32>
    %210 = vector.shape_cast %209 : vector<1x16x32xf32> to vector<16x32xf32>
    %cst_153 = arith.constant dense<0.000000e+00> : vector<9x32xf32>
    %211 = tpu.matmul %208, %210, %cst_153 {dimension_numbers = #tpu.dot_dimension_numbers<[1], [0], [0], [1], [0, 0, 1, 1], [], []>} : vector<9x16xf32>, vector<16x32xf32>, vector<9x32xf32> -> vector<9x32xf32>
    %212 = arith.addf %198, %211 : vector<9x32xf32>
    %c0_154 = arith.constant 0 : index
    %c15 = arith.constant 15 : index
    %c0_155 = arith.constant 0 : index
    %c0_156 = arith.constant 0 : index
    %213 = vector.load %arg1[%c0_154, %c15, %c0_155, %c0_156] : memref<1x16x9x256xf32, #tpu.memory_space<vmem>>, vector<1x1x9x256xf32>
    %214 = vector.shape_cast %213 : vector<1x1x9x256xf32> to vector<9x256xf32>
    %cst_157 = arith.constant dense<0.000000e+00> : vector<9x16xf32>
    %215 = tpu.matmul %214, %0, %cst_157 {dimension_numbers = #tpu.dot_dimension_numbers<[1], [0], [0], [1], [0, 0, 1, 1], [], []>} : vector<9x256xf32>, vector<256x16xf32>, vector<9x16xf32> -> vector<9x16xf32>
    %216 = vector.broadcast %1 : vector<1x16xf32> to vector<9x16xf32>
    %217 = arith.addf %215, %216 : vector<9x16xf32>
    %cst_158 = arith.constant 0.000000e+00 : f32
    %218 = vector.broadcast %cst_158 : f32 to vector<9x16xf32>
    %219 = arith.cmpf oge, %217, %218 : vector<9x16xf32>
    %cst_159 = arith.constant 0.00999999977 : f32
    %220 = vector.broadcast %cst_159 : f32 to vector<9x16xf32>
    %221 = arith.mulf %220, %217 : vector<9x16xf32>
    %222 = arith.select %219, %217, %221 : vector<9x16xi1>, vector<9x16xf32>
    %c15_160 = arith.constant 15 : index
    %c0_161 = arith.constant 0 : index
    %c0_162 = arith.constant 0 : index
    %223 = vector.load %arg4[%c15_160, %c0_161, %c0_162] : memref<16x16x32xf32, #tpu.memory_space<vmem>>, vector<1x16x32xf32>
    %224 = vector.shape_cast %223 : vector<1x16x32xf32> to vector<16x32xf32>
    %cst_163 = arith.constant dense<0.000000e+00> : vector<9x32xf32>
    %225 = tpu.matmul %222, %224, %cst_163 {dimension_numbers = #tpu.dot_dimension_numbers<[1], [0], [0], [1], [0, 0, 1, 1], [], []>} : vector<9x16xf32>, vector<16x32xf32>, vector<9x32xf32> -> vector<9x32xf32>
    %226 = arith.addf %212, %225 : vector<9x32xf32>
    %c0_164 = arith.constant 0 : index
    %c0_165 = arith.constant 0 : index
    %227 = vector.load %arg5[%c0_164, %c0_165] : memref<1x32xf32, #tpu.memory_space<vmem>>, vector<1x32xf32>
    %228 = vector.broadcast %227 : vector<1x32xf32> to vector<9x32xf32>
    %229 = arith.addf %226, %228 : vector<9x32xf32>
    %cst_166 = arith.constant 0.000000e+00 : f32
    %230 = vector.broadcast %cst_166 : f32 to vector<9x32xf32>
    %231 = arith.cmpf oge, %229, %230 : vector<9x32xf32>
    %cst_167 = arith.constant 0.00999999977 : f32
    %232 = vector.broadcast %cst_167 : f32 to vector<9x32xf32>
    %233 = arith.mulf %232, %229 : vector<9x32xf32>
    %234 = arith.select %231, %229, %233 : vector<9x32xi1>, vector<9x32xf32>
    %c0_168 = arith.constant 0 : index
    %c0_169 = arith.constant 0 : index
    %235 = vector.load %arg7[%c0_168, %c0_169] : memref<1x256xf32, #tpu.memory_space<vmem>>, vector<1x256xf32>
    %236 = vector.extract_strided_slice %234 {offsets = [0, 0], sizes = [1, 32], strides = [1, 1]} : vector<9x32xf32> to vector<1x32xf32>
    %c0_170 = arith.constant 0 : index
    %c0_171 = arith.constant 0 : index
    %c0_172 = arith.constant 0 : index
    %237 = vector.load %arg6[%c0_170, %c0_171, %c0_172] : memref<9x32x256xf32, #tpu.memory_space<vmem>>, vector<1x32x256xf32>
    %238 = vector.shape_cast %237 : vector<1x32x256xf32> to vector<32x256xf32>
    %cst_173 = arith.constant dense<0.000000e+00> : vector<1x256xf32>
    %239 = tpu.matmul %236, %238, %cst_173 {dimension_numbers = #tpu.dot_dimension_numbers<[1], [0], [0], [1], [0, 0, 1, 1], [], []>} : vector<1x32xf32>, vector<32x256xf32>, vector<1x256xf32> -> vector<1x256xf32>
    %240 = arith.addf %235, %239 : vector<1x256xf32>
    %241 = vector.extract_strided_slice %234 {offsets = [1, 0], sizes = [1, 32], strides = [1, 1]} : vector<9x32xf32> to vector<1x32xf32>
    %c1_174 = arith.constant 1 : index
    %c0_175 = arith.constant 0 : index
    %c0_176 = arith.constant 0 : index
    %242 = vector.load %arg6[%c1_174, %c0_175, %c0_176] : memref<9x32x256xf32, #tpu.memory_space<vmem>>, vector<1x32x256xf32>
    %243 = vector.shape_cast %242 : vector<1x32x256xf32> to vector<32x256xf32>
    %cst_177 = arith.constant dense<0.000000e+00> : vector<1x256xf32>
    %244 = tpu.matmul %241, %243, %cst_177 {dimension_numbers = #tpu.dot_dimension_numbers<[1], [0], [0], [1], [0, 0, 1, 1], [], []>} : vector<1x32xf32>, vector<32x256xf32>, vector<1x256xf32> -> vector<1x256xf32>
    %245 = arith.addf %240, %244 : vector<1x256xf32>
    %246 = vector.extract_strided_slice %234 {offsets = [2, 0], sizes = [1, 32], strides = [1, 1]} : vector<9x32xf32> to vector<1x32xf32>
    %c2_178 = arith.constant 2 : index
    %c0_179 = arith.constant 0 : index
    %c0_180 = arith.constant 0 : index
    %247 = vector.load %arg6[%c2_178, %c0_179, %c0_180] : memref<9x32x256xf32, #tpu.memory_space<vmem>>, vector<1x32x256xf32>
    %248 = vector.shape_cast %247 : vector<1x32x256xf32> to vector<32x256xf32>
    %cst_181 = arith.constant dense<0.000000e+00> : vector<1x256xf32>
    %249 = tpu.matmul %246, %248, %cst_181 {dimension_numbers = #tpu.dot_dimension_numbers<[1], [0], [0], [1], [0, 0, 1, 1], [], []>} : vector<1x32xf32>, vector<32x256xf32>, vector<1x256xf32> -> vector<1x256xf32>
    %250 = arith.addf %245, %249 : vector<1x256xf32>
    %251 = vector.extract_strided_slice %234 {offsets = [3, 0], sizes = [1, 32], strides = [1, 1]} : vector<9x32xf32> to vector<1x32xf32>
    %c3_182 = arith.constant 3 : index
    %c0_183 = arith.constant 0 : index
    %c0_184 = arith.constant 0 : index
    %252 = vector.load %arg6[%c3_182, %c0_183, %c0_184] : memref<9x32x256xf32, #tpu.memory_space<vmem>>, vector<1x32x256xf32>
    %253 = vector.shape_cast %252 : vector<1x32x256xf32> to vector<32x256xf32>
    %cst_185 = arith.constant dense<0.000000e+00> : vector<1x256xf32>
    %254 = tpu.matmul %251, %253, %cst_185 {dimension_numbers = #tpu.dot_dimension_numbers<[1], [0], [0], [1], [0, 0, 1, 1], [], []>} : vector<1x32xf32>, vector<32x256xf32>, vector<1x256xf32> -> vector<1x256xf32>
    %255 = arith.addf %250, %254 : vector<1x256xf32>
    %256 = vector.extract_strided_slice %234 {offsets = [4, 0], sizes = [1, 32], strides = [1, 1]} : vector<9x32xf32> to vector<1x32xf32>
    %c4_186 = arith.constant 4 : index
    %c0_187 = arith.constant 0 : index
    %c0_188 = arith.constant 0 : index
    %257 = vector.load %arg6[%c4_186, %c0_187, %c0_188] : memref<9x32x256xf32, #tpu.memory_space<vmem>>, vector<1x32x256xf32>
    %258 = vector.shape_cast %257 : vector<1x32x256xf32> to vector<32x256xf32>
    %cst_189 = arith.constant dense<0.000000e+00> : vector<1x256xf32>
    %259 = tpu.matmul %256, %258, %cst_189 {dimension_numbers = #tpu.dot_dimension_numbers<[1], [0], [0], [1], [0, 0, 1, 1], [], []>} : vector<1x32xf32>, vector<32x256xf32>, vector<1x256xf32> -> vector<1x256xf32>
    %260 = arith.addf %255, %259 : vector<1x256xf32>
    %261 = vector.extract_strided_slice %234 {offsets = [5, 0], sizes = [1, 32], strides = [1, 1]} : vector<9x32xf32> to vector<1x32xf32>
    %c5_190 = arith.constant 5 : index
    %c0_191 = arith.constant 0 : index
    %c0_192 = arith.constant 0 : index
    %262 = vector.load %arg6[%c5_190, %c0_191, %c0_192] : memref<9x32x256xf32, #tpu.memory_space<vmem>>, vector<1x32x256xf32>
    %263 = vector.shape_cast %262 : vector<1x32x256xf32> to vector<32x256xf32>
    %cst_193 = arith.constant dense<0.000000e+00> : vector<1x256xf32>
    %264 = tpu.matmul %261, %263, %cst_193 {dimension_numbers = #tpu.dot_dimension_numbers<[1], [0], [0], [1], [0, 0, 1, 1], [], []>} : vector<1x32xf32>, vector<32x256xf32>, vector<1x256xf32> -> vector<1x256xf32>
    %265 = arith.addf %260, %264 : vector<1x256xf32>
    %266 = vector.extract_strided_slice %234 {offsets = [6, 0], sizes = [1, 32], strides = [1, 1]} : vector<9x32xf32> to vector<1x32xf32>
    %c6_194 = arith.constant 6 : index
    %c0_195 = arith.constant 0 : index
    %c0_196 = arith.constant 0 : index
    %267 = vector.load %arg6[%c6_194, %c0_195, %c0_196] : memref<9x32x256xf32, #tpu.memory_space<vmem>>, vector<1x32x256xf32>
    %268 = vector.shape_cast %267 : vector<1x32x256xf32> to vector<32x256xf32>
    %cst_197 = arith.constant dense<0.000000e+00> : vector<1x256xf32>
    %269 = tpu.matmul %266, %268, %cst_197 {dimension_numbers = #tpu.dot_dimension_numbers<[1], [0], [0], [1], [0, 0, 1, 1], [], []>} : vector<1x32xf32>, vector<32x256xf32>, vector<1x256xf32> -> vector<1x256xf32>
    %270 = arith.addf %265, %269 : vector<1x256xf32>
    %271 = vector.extract_strided_slice %234 {offsets = [7, 0], sizes = [1, 32], strides = [1, 1]} : vector<9x32xf32> to vector<1x32xf32>
    %c7_198 = arith.constant 7 : index
    %c0_199 = arith.constant 0 : index
    %c0_200 = arith.constant 0 : index
    %272 = vector.load %arg6[%c7_198, %c0_199, %c0_200] : memref<9x32x256xf32, #tpu.memory_space<vmem>>, vector<1x32x256xf32>
    %273 = vector.shape_cast %272 : vector<1x32x256xf32> to vector<32x256xf32>
    %cst_201 = arith.constant dense<0.000000e+00> : vector<1x256xf32>
    %274 = tpu.matmul %271, %273, %cst_201 {dimension_numbers = #tpu.dot_dimension_numbers<[1], [0], [0], [1], [0, 0, 1, 1], [], []>} : vector<1x32xf32>, vector<32x256xf32>, vector<1x256xf32> -> vector<1x256xf32>
    %275 = arith.addf %270, %274 : vector<1x256xf32>
    %276 = vector.extract_strided_slice %234 {offsets = [8, 0], sizes = [1, 32], strides = [1, 1]} : vector<9x32xf32> to vector<1x32xf32>
    %c8_202 = arith.constant 8 : index
    %c0_203 = arith.constant 0 : index
    %c0_204 = arith.constant 0 : index
    %277 = vector.load %arg6[%c8_202, %c0_203, %c0_204] : memref<9x32x256xf32, #tpu.memory_space<vmem>>, vector<1x32x256xf32>
    %278 = vector.shape_cast %277 : vector<1x32x256xf32> to vector<32x256xf32>
    %cst_205 = arith.constant dense<0.000000e+00> : vector<1x256xf32>
    %279 = tpu.matmul %276, %278, %cst_205 {dimension_numbers = #tpu.dot_dimension_numbers<[1], [0], [0], [1], [0, 0, 1, 1], [], []>} : vector<1x32xf32>, vector<32x256xf32>, vector<1x256xf32> -> vector<1x256xf32>
    %280 = arith.addf %275, %279 : vector<1x256xf32>
    %cst_206 = arith.constant 0.000000e+00 : f32
    %281 = vector.broadcast %cst_206 : f32 to vector<1x256xf32>
    %282 = arith.cmpf oge, %280, %281 : vector<1x256xf32>
    %cst_207 = arith.constant 0.00999999977 : f32
    %283 = vector.broadcast %cst_207 : f32 to vector<1x256xf32>
    %284 = arith.mulf %283, %280 : vector<1x256xf32>
    %285 = arith.select %282, %280, %284 : vector<1x256xi1>, vector<1x256xf32>
    %c0_208 = arith.constant 0 : index
    %c0_209 = arith.constant 0 : index
    %286 = vector.load %arg8[%c0_208, %c0_209] : memref<256x6xf32, #tpu.memory_space<vmem>>, vector<256x6xf32>
    %cst_210 = arith.constant dense<0.000000e+00> : vector<1x6xf32>
    %287 = tpu.matmul %285, %286, %cst_210 {dimension_numbers = #tpu.dot_dimension_numbers<[1], [0], [0], [1], [0, 0, 1, 1], [], []>} : vector<1x256xf32>, vector<256x6xf32>, vector<1x6xf32> -> vector<1x6xf32>
    %c0_211 = arith.constant 0 : index
    %c0_212 = arith.constant 0 : index
    %288 = vector.load %arg9[%c0_211, %c0_212] : memref<1x6xf32, #tpu.memory_space<vmem>>, vector<1x6xf32>
    %289 = arith.addf %287, %288 : vector<1x6xf32>
    %cst_213 = arith.constant dense<0xFF800000> : vector<1xf32>
    %290 = vector.multi_reduction <maximumf>, %289, %cst_213 [1] : vector<1x6xf32> to vector<1xf32>
    %291 = vector.shape_cast %290 : vector<1xf32> to vector<1x1xf32>
    %292 = vector.broadcast %291 : vector<1x1xf32> to vector<1x6xf32>
    %293 = arith.subf %289, %292 : vector<1x6xf32>
    %294 = math.exp %293 : vector<1x6xf32>
    %cst_214 = arith.constant dense<0.000000e+00> : vector<1xf32>
    %295 = vector.multi_reduction <add>, %294, %cst_214 [1] : vector<1x6xf32> to vector<1xf32>
    %296 = vector.shape_cast %295 : vector<1xf32> to vector<1x1xf32>
    %297 = tpu.reciprocal %296 {approx = true} : vector<1x1xf32> -> vector<1x1xf32>
    %298 = vector.broadcast %297 : vector<1x1xf32> to vector<1x6xf32>
    %299 = arith.mulf %294, %298 : vector<1x6xf32>
    %c0_215 = arith.constant 0 : index
    %c0_216 = arith.constant 0 : index
    %c0_217 = arith.constant 0 : index
    %300 = vector.load %arg10[%c0_215, %c0_216, %c0_217] : memref<1x1x6xf32, #tpu.memory_space<vmem>>, vector<1x1x6xf32>
    %301 = vector.shape_cast %300 : vector<1x1x6xf32> to vector<1x6xf32>
    %302 = vector.shape_cast %299 : vector<1x6xf32> to vector<1x1x6xf32>
    tpu.vector_store %arg10[%c0_215, %c0_216, %c0_217], %302 {strides = array<i32>} : memref<1x1x6xf32, #tpu.memory_space<vmem>>, vector<1x1x6xf32>,
    return
  }
  func.func @transform_0(%arg0: i32) -> (i32, i32, i32, i32) {
    %c0_i32 = arith.constant 0 : i32
    %c0_i32_0 = arith.constant 0 : i32
    %c0_i32_1 = arith.constant 0 : i32
    %c0_i32_2 = arith.constant 0 : i32
    return %arg0, %c0_i32, %c0_i32_0, %c0_i32_1 : i32, i32, i32, i32
  }
  func.func @transform_1(%arg0: i32) -> (i32, i32) {
    %c0_i32 = arith.constant 0 : i32
    %c0_i32_0 = arith.constant 0 : i32
    %c0_i32_1 = arith.constant 0 : i32
    return %c0_i32, %c0_i32_0 : i32, i32
  }
  func.func @transform_2(%arg0: i32) -> (i32, i32) {
    %c0_i32 = arith.constant 0 : i32
    %c0_i32_0 = arith.constant 0 : i32
    %c0_i32_1 = arith.constant 0 : i32
    return %c0_i32, %c0_i32_0 : i32, i32
  }
  func.func @transform_3(%arg0: i32) -> (i32, i32, i32) {
    %c0_i32 = arith.constant 0 : i32
    %c0_i32_0 = arith.constant 0 : i32
    %c0_i32_1 = arith.constant 0 : i32
    %c0_i32_2 = arith.constant 0 : i32
    return %c0_i32, %c0_i32_0, %c0_i32_1 : i32, i32, i32
  }
  func.func @transform_4(%arg0: i32) -> (i32, i32) {
    %c0_i32 = arith.constant 0 : i32
    %c0_i32_0 = arith.constant 0 : i32
    %c0_i32_1 = arith.constant 0 : i32
    return %c0_i32, %c0_i32_0 : i32, i32
  }
  func.func @transform_5(%arg0: i32) -> (i32, i32, i32) {
    %c0_i32 = arith.constant 0 : i32
    %c0_i32_0 = arith.constant 0 : i32
    %c0_i32_1 = arith.constant 0 : i32
    %c0_i32_2 = arith.constant 0 : i32
    return %c0_i32, %c0_i32_0, %c0_i32_1 : i32, i32, i32
  }
  func.func @transform_6(%arg0: i32) -> (i32, i32) {
    %c0_i32 = arith.constant 0 : i32
    %c0_i32_0 = arith.constant 0 : i32
    %c0_i32_1 = arith.constant 0 : i32
    return %c0_i32, %c0_i32_0 : i32, i32
  }
  func.func @transform_7(%arg0: i32) -> (i32, i32) {
    %c0_i32 = arith.constant 0 : i32
    %c0_i32_0 = arith.constant 0 : i32
    %c0_i32_1 = arith.constant 0 : i32
    return %c0_i32, %c0_i32_0 : i32, i32
  }
  func.func @transform_8(%arg0: i32) -> (i32, i32) {
    %c0_i32 = arith.constant 0 : i32
    %c0_i32_0 = arith.constant 0 : i32
    %c0_i32_1 = arith.constant 0 : i32
    return %c0_i32, %c0_i32_0 : i32, i32
  }
  func.func @transform_9(%arg0: i32) -> (i32, i32, i32) {
    %c0_i32 = arith.constant 0 : i32
    %c0_i32_0 = arith.constant 0 : i32
    %c0_i32_1 = arith.constant 0 : i32
    return %arg0, %c0_i32, %c0_i32_0 : i32, i32, i32
  }
}

</mosaic_0001>

<bundles_post_ra>
// kernel: dqn_forward.1
= control target key start
LH: loop header
LB: loop body
LE: loop exit
PB: predicated region body
PF: predicated region fallthrough
CT: control target
= control target key end

     0   :  { %14 = vsyncpa [#allocation3], 0  ;;  %s7245_s0 = inlined_call_operand.vmem [shape: f32[2,16,9,256], index: 0, kind: input, shape index: {}]   ;;  %s7246_s1 = inlined_call_operand.vmem [shape: f32[256,16], index: 1, kind: input, shape index: {}]   ;;  %s7247_s2 = inlined_call_operand.vmem [shape: f32[1,16], index: 2, kind: input, shape index: {}]   ;;  %s7248_s3 = inlined_call_operand.vmem [shape: f32[16,16,32], index: 3, kind: input, shape index: {}]   ;;  %s7249_s4 = inlined_call_operand.vmem [shape: f32[1,32], index: 4, kind: input, shape index: {}]   ;;  %s7250_s5 = inlined_call_operand.vmem [shape: f32[9,32,256], index: 5, kind: input, shape index: {}]   ;;  %s7251_s6 = inlined_call_operand.vmem [shape: f32[1,256], index: 6, kind: input, shape index: {}]   ;;  %s7252_s7 = inlined_call_operand.vmem [shape: f32[256,6], index: 7, kind: input, shape index: {}]   ;;  %s7253_s8 = inlined_call_operand.vmem [shape: f32[1,6], index: 8, kind: input, shape index: {}]   ;;  %s7254_s9 = inlined_call_operand.hbm [shape: f32[2,1,6], index: 9, kind: output, shape index: {}]  }
   0x1   :  { %16 = vsyncpa [#allocation3 + $0x1], 0  ;;  %s6147_s30 = smov 0   ;;  %s6149_s10 = smov 0  }
   0x2   :  { %s6151_s11 = smov 0   ;;  %s6153_s12 = smov 0  }
   0x3 LB: > { %s6168_s13 = sadd.s32 4294967295, %s6092_s12   ;;  %s4248_s14 = sadd.s32 4294967294, %s6092_s12   ;;  %s6092_s12 = sphi %s6153_s12, %s7260_s12   ;;  %s6088_s11 = sphi %s6151_s11, %s7259_s11   ;;  %s6084_s10 = sphi %s6149_s10, %s7258_s10   ;;  %s6080_s30 = sphi %s6147_s30, %s7257_s30  }
   0x4   : > { %s6172_s15 = sadd.s32 1, %s6092_s12   ;;  %s223_s16 = sadd.s32 1, %s6088_s11 }
   0x5   : > { %s220_s17 = ssub.s32 %s6092_s12, %s6172_s15  ;;  %p233_p0 = scmp.ne.s32.totalorder %s6088_s11, %s6084_s10 }
   0x6   : > { %p221_p1 = scmp.eq.s32.totalorder %s220_s17, 0  ;;  %p234_p2 = scmp.eq.s32.totalorder %s6168_s13, 1 }
   0x7   : > { %p239_p3 = scmp.ne.s32.totalorder %s6084_s10, %s6080_s30  ;;  %p240_p4 = scmp.eq.s32.totalorder %s4248_s14, 1 }
   0x8   : > { %s6183_s18 = scalar_select %p221_p1, %s6088_s11, %s223_s16  }
   0x9   : > { %p6185_p5 = por %p234_p2, %p233_p0  ;;  %p6189_p6 = por %p240_p4, %p239_p3 }
   0xa   : > { %p4251_p7 = scmp.ge.s32.totalorder %s6092_s12, 1  ;;  %p290_p8 = scmp.lt.s32.totalorder %s6092_s12, 3 }
   0xc   : > { %p291_p9 = pnand %p4251_p7, %p290_p8 }
   0xd   : > { %v346_v0 = vld [vmem:[%s7246_s1 + $0x80] sm:$0xff] (!%p291_p9)  ;;  %v347_v1 = vld [vmem:[%s7246_s1 + $0x88] sm:$0xff] (!%p291_p9)  ;;  %p325_p10 = scmp.lt.s32.totalorder (!%p291_p9), %s6168_s13, 1  ;;  %v348_v5 = vld [vmem:[%s7246_s1 + $0x90] sm:$0xff] (!%p291_p9)  ;;  %vm545_vm1 = vcmask (!%p291_p9), 130048   ;;  %s323_s22 = sand.u32 (!%p291_p9), 1, %s6084_s10  }
   0xe   : > { %294 = sbr.rel (%p291_p9) target bundleno = 2918 (0xb66), region = 56  ;;  %v330_v2 = vld [vmem:[%s7246_s1] sm:$0xff] (!%p291_p9)  ;;  %v6205_v3 = vpack.c.bf16 (!%p291_p9), %v347_v1, %v346_v0  ;;  %v331_v4 = vld [vmem:[%s7246_s1 + $0x8] sm:$0xff] (!%p291_p9)  ;;  %v349_v6 = vld [vmem:[%s7246_s1 + $0x98] sm:$0xff] (!%p291_p9)  ;;  %s324_s23 = scalar_lea.vmem (!%p291_p9), [#allocation2], %s323_s22 }
   0xf   : > { %v6216_v7 = vpack.c.bf16 (!%p291_p9), %v331_v4, %v330_v2  ;;  %v6218_v8 = vpack.c.bf16 (!%p291_p9), %v349_v6, %v348_v5  ;;  %v332_v9 = vld [vmem:[%s7246_s1 + $0x10] sm:$0xff] (!%p291_p9)  ;;  %v333_v10 = vld [vmem:[%s7246_s1 + $0x18] sm:$0xff] (!%p291_p9)  ;;  %v350_v11 = vld [vmem:[%s7246_s1 + $0xa0] sm:$0xff] (!%p291_p9)  ;;  %s4193_s24 = sshll.u32 (!%p291_p9), %s324_s23, 4  ;;  %s7204_s24 = int_to_ptr.vmem [resolvable:$true] %s4193_s24 }
  0x10   : > { %5307 = vmatprep.subr.bf16.mxu1 (!%p291_p9), %v6205_v3  ;;  %v351_v12 = vld [vmem:[%s7246_s1 + $0xa8] sm:$0xff] (!%p291_p9)  ;;  %5275 = vmatprep.subr.bf16.mxu0 (!%p291_p9), %v6205_v3  ;;  %v6236_v13 = vpack.c.bf16 (!%p291_p9), %v333_v10, %v332_v9  ;;  %v334_v15 = vld [vmem:[%s7246_s1 + $0x20] sm:$0xff] (!%p291_p9)  ;;  %v352_v17 = vld [vmem:[%s7246_s1 + $0xb0] sm:$0xff] (!%p291_p9)  ;;  %s6030_s28 = scalar_lea.vmem (!%p291_p9), %s7204_s24, 16 }
  0x11   : > { %5309 = vmatpush3.bf16.msra.mxu1 (!%p291_p9), %v6216_v7  ;;  %5277 = vmatpush3.bf16.msra.mxu0 (!%p291_p9), %v6216_v7  ;;  %v6240_v14 = vpack.c.bf16 (!%p291_p9), %v351_v12, %v350_v11  ;;  %v335_v16 = vld [vmem:[%s7246_s1 + $0x28] sm:$0xff] (!%p291_p9)  ;;  %v353_v18 = vld [vmem:[%s7246_s1 + $0xb8] sm:$0xff] (!%p291_p9)  ;;  %v336_v21 = vld [vmem:[%s7246_s1 + $0x30] sm:$0xff] (!%p291_p9)  ;;  %p6031_p11 = scmp.ne.s32.totalorder (!%p291_p9), %s7204_s24, %s6030_s28 }
  0x12   : > { %5311 = vmatprep.subr.bf16.mxu1 (!%p291_p9), %v6218_v8  ;;  %5279 = vmatprep.subr.bf16.mxu0 (!%p291_p9), %v6218_v8  ;;  %v6261_v19 = vpack.c.bf16 (!%p291_p9), %v335_v16, %v334_v15  ;;  %v6265_v20 = vpack.c.bf16 (!%p291_p9), %v353_v18, %v352_v17  ;;  %v337_v22 = vld [vmem:[%s7246_s1 + $0x38] sm:$0xff] (!%p291_p9)  ;;  %v354_v23 = vld [vmem:[%s7246_s1 + $0xc0] sm:$0xff] (!%p291_p9)  ;;  %v355_v24 = vld [vmem:[%s7246_s1 + $0xc8] sm:$0xff] (!%p291_p9) }
  0x13   : > { %v6282_v26 = vpack.c.bf16 (!%p291_p9), %v337_v22, %v336_v21  ;;  %v6287_v28 = vpack.c.bf16 (!%p291_p9), %v355_v24, %v354_v23  ;;  %v338_v29 = vld [vmem:[%s7246_s1 + $0x40] sm:$0xff] (!%p291_p9)  ;;  %v339_v30 = vld [vmem:[%s7246_s1 + $0x48] sm:$0xff] (!%p291_p9)  ;;  %v356_v31 = vld [vmem:[%s7246_s1 + $0xd0] sm:$0xff] (!%p291_p9)  ;;  %p6032_p12 = pnand (!%p291_p9), %p6031_p11, %p6185_p5 }
  0x14   : > { %v357_v32 = vld [vmem:[%s7246_s1 + $0xd8] sm:$0xff] (!%p291_p9)  ;;  %v6303_v33 = vpack.c.bf16 (!%p291_p9), %v339_v30, %v338_v29  ;;  %v340_v35 = vld [vmem:[%s7246_s1 + $0x50] sm:$0xff] (!%p291_p9)  ;;  %v358_v37 = vld [vmem:[%s7246_s1 + $0xe0] sm:$0xff] (!%p291_p9) }
  0x15   : > { %s326_s27 = scalar_select %p325_p10, %s6168_s13, 1  ;;  %5313 = vmatpush3.bf16.msra.mxu1 %v6236_v13  ;;  %5281 = vmatpush3.bf16.msra.mxu0 %v6236_v13  ;;  %v6307_v34 = vpack.c.bf16 %v357_v32, %v356_v31  ;;  %v341_v36 = vld [vmem:[%s7246_s1 + $0x58] sm:$0xff]  ;;  %v359_v38 = vld [vmem:[%s7246_s1 + $0xe8] sm:$0xff]  ;;  %v342_v41 = vld [vmem:[%s7246_s1 + $0x60] sm:$0xff] }
  0x16   : > { %5315 = vmatprep.subr.bf16.mxu1 %v6240_v14  ;;  %5283 = vmatprep.subr.bf16.mxu0 %v6240_v14  ;;  %v6323_v39 = vpack.c.bf16 %v341_v36, %v340_v35  ;;  %v6327_v40 = vpack.c.bf16 %v359_v38, %v358_v37  ;;  %v343_v42 = vld [vmem:[%s7246_s1 + $0x68] sm:$0xff]  ;;  %v360_v43 = vld [vmem:[%s7246_s1 + $0xf0] sm:$0xff]  ;;  %v361_v44 = vld [vmem:[%s7246_s1 + $0xf8] sm:$0xff]  ;;  %p6033_p13 = pneg %p6032_p12 }
  0x17   : > { %s4454_s14 = sshll.u32 %s326_s27, 9  ;;  %v6343_v45 = vpack.c.bf16 %v343_v42, %v342_v41  ;;  %v6347_v46 = vpack.c.bf16 %v361_v44, %v360_v43  ;;  %v344_v47 = vld [vmem:[%s7246_s1 + $0x70] sm:$0xff]  ;;  %v345_v48 = vld [vmem:[%s7246_s1 + $0x78] sm:$0xff]  ;;  %v454_v63 = vld [vmem:[%s7248_s3] sm:$0xff]  ;;  %s4181_s27 = scalar_lea.sflag [#allocation3], %s323_s22 }
  0x18   : > { %s6258_s29 = scalar_lea.vmem %s7245_s0, %s4454_s14  ;;  %v6357_v49 = vpack.c.bf16 %v345_v48, %v344_v47  ;;  %v4259_v60 = vld [vmem:[%s7248_s3 + $0x10] sm:$0xff]  ;;  %v4260_v61 = vld [vmem:[%s7248_s3 + $0x18] sm:$0xff]  ;;  %v455_v0 = vld [vmem:[%s7248_s3 + $0x8] sm:$0xff]  ;;  %s4451_s14 = sshll.u32 %s6168_s13, 4 }
  0x19   : > { %v4256_v25 = vld [vmem:[%s6258_s29 + $0x28] sm:$0xff]  ;;  %5317 = vmatpush3.bf16.msra.mxu1 %v6261_v19  ;;  %5285 = vmatpush3.bf16.msra.mxu0 %v6261_v19  ;;  %v4255_v50 = vld [vmem:[%s6258_s29 + $0x20] sm:$0xff]  ;;  %v4258_v52 = vld [vmem:[%s6258_s29 + $0x38] sm:$0x1]  ;;  %v5338_v62 = vpack.c.bf16 %v4260_v61, %v4259_v60  ;;  %v5342_v1 = vpack.c.bf16 %v455_v0, %v454_v63  ;;  %s6096_s13 = smov [#allocation2]  }
  0x1a   : > { %525 = vmatprep.mubr.f32.mxu1 %v4256_v25  ;;  %v364_v27 = vld [vmem:[%s6258_s29 + $0x8] sm:$0xff]  ;;  %5319 = vmatprep.subr.bf16.mxu1 %v6265_v20  ;;  %v363_v51 = vld [vmem:[%s6258_s29] sm:$0xff]  ;;  %v366_v53 = vld [vmem:[%s6258_s29 + $0x18] sm:$0x1]  ;;  %s6034_s16 = sshll.u32 %s6096_s13, 4  ;;  %s6035_s16 = int_to_ptr.vmem [resolvable:$false] %s6034_s16 }
  0x1b   : > { %5287 = vmatprep.subr.bf16.mxu0 %v6265_v20  ;;  %437 = vmatprep.mubr.f32.mxu0 %v364_v27  ;;  %v4257_v54 = vld [vmem:[%s6258_s29 + $0x30] sm:$0x1]  ;;  %v4266_v56 = vld [vmem:[%s6258_s29 + $0x48] sm:$0xff]  ;;  %v4265_v57 = vld [vmem:[%s6258_s29 + $0x40] sm:$0xff]  ;;  %s6036_s17 = scalar_lea.vmem %s6035_s16, 32  ;;  %p6037_p0 = scmp.lt.s32.totalorder %s7204_s24, %s6035_s16 }
  0x1c   : > { %v365_v55 = vld [vmem:[%s6258_s29 + $0x10] sm:$0x1]  ;;  %v4268_v58 = vld [vmem:[%s6258_s29 + $0x58] sm:$0x1]  ;;  %v4282_v2 = vld [vmem:[%s6258_s29 + $0x88] sm:$0xff]  ;;  %p6038_p1 = scmp.lt.s32.totalorder %s6036_s17, %s6030_s28 }
  0x1d   : > { %5321 = vmatpush3.bf16.msra.mxu1 %v6282_v26  ;;  %5289 = vmatpush3.bf16.msra.mxu0 %v6282_v26  ;;  %v4267_v59 = vld [vmem:[%s6258_s29 + $0x50] sm:$0x1]  ;;  %v4281_v4 = vld [vmem:[%s6258_s29 + $0x80] sm:$0xff]  ;;  %v4284_v5 = vld [vmem:[%s6258_s29 + $0x98] sm:$0x1] }
  0x1e   : > { %5323 = vmatprep.subr.bf16.mxu1 %v6287_v28  ;;  %5291 = vmatprep.subr.bf16.mxu0 %v6287_v28  ;;  %v4283_v6 = vld [vmem:[%s6258_s29 + $0x90] sm:$0x1]  ;;  %v6442_v11 = vld [vmem:[%s7247_s2] ss:$0 sm:$0xff]  ;;  %v4270_v37 = vld [vmem:[%s7248_s3 + $0x28] sm:$0xff]  ;;  %p6039_p2 = por %p6038_p1, %p6037_p0 }
  0x1f   : > { %v4269_v36 = vld [vmem:[%s7248_s3 + $0x20] sm:$0xff]  ;;  %v4274_v61 = vld [vmem:[%s6258_s29 + $0x68] sm:$0xff]  ;;  %v4276_v0 = vld [vmem:[%s6258_s29 + $0x78] sm:$0x1] }
  0x20   : > { %v5378_v43 = vpack.c.bf16 %v4270_v37, %v4269_v36  ;;  %v4273_v63 = vld [vmem:[%s6258_s29 + $0x60] sm:$0xff]  ;;  %p6040_p3 = pnand %p6039_p2, %p6033_p13 }
  0x21   : > { %5325 = vmatpush3.bf16.msra.mxu1 %v6303_v33  ;;  %5293 = vmatpush3.bf16.msra.mxu0 %v6303_v33 }
  0x22   : > { %5327 = vmatprep.subr.bf16.mxu1 %v6307_v34  ;;  %5295 = vmatprep.subr.bf16.mxu0 %v6307_v34 }
  0x25   : > { %5329 = vmatpush3.bf16.msra.mxu1 %v6323_v39  ;;  %5297 = vmatpush3.bf16.msra.mxu0 %v6323_v39 }
  0x26   : > { %5331 = vmatprep.subr.bf16.mxu1 %v6327_v40  ;;  %5299 = vmatprep.subr.bf16.mxu0 %v6327_v40 }
  0x29   : > { %5333 = vmatpush3.bf16.msra.mxu1 %v6343_v45  ;;  %5301 = vmatpush3.bf16.msra.mxu0 %v6343_v45 }
  0x2a   : > { %5335 = vmatprep.subr.bf16.mxu1 %v6347_v46  ;;  %5303 = vmatprep.subr.bf16.mxu0 %v6347_v46 }
  0x2d   : > { %5337 = vmatpush3.bf16.msra.mxu1 %v6357_v49  ;;  %5305 = vmatpush3.bf16.msra.mxu0 %v6357_v49 }
  0x2e   : > { %5347 = vmatprep.subr.bf16.mxu1 %v6205_v3  ;;  %5339 = vmatprep.subr.bf16.mxu0 %v5338_v62 }
  0x30   : > { %526 = vmatmul.mubr.f32.vlgmr.msra.gmra.mrb[0].mxu1 %v4255_v50  ;;  %438 = vmatmul.mubr.f32.vlgmr.msra.gmra.mrb[0].mxu0 %v363_v51 }
  0x31   : > { %5349 = vmatpush3.bf16.msra.mxu1 %v6216_v7  ;;  %530 = vmatprep.mubr.f32.mxu1 %v4258_v52 }
  0x32   : > { %5351 = vmatprep.subr.bf16.mxu1 %v6218_v8  ;;  %442 = vmatprep.mubr.f32.mxu0 %v366_v53 }
  0x33   : > { %5341 = vmatpush3.bf16.msra.mxu0 %v5338_v62 }
  0x34   : > { %531 = vmatmul.mubr.f32.gmra.mrb[2].mxu1 %v4257_v54  ;;  %443 = vmatmul.mubr.f32.gmra.mrb[2].mxu0 %v365_v55 }
  0x35   : > { %5353 = vmatpush3.bf16.msra.mxu1 %v6236_v13  ;;  %777 = vmatprep.mubr.f32.mxu1 %v4266_v56 }
  0x36   : > { %5355 = vmatprep.subr.bf16.mxu1 %v6240_v14  ;;  %5343 = vmatprep.subr.bf16.mxu0 %v5342_v1 }
  0x39   : > { %5357 = vmatpush3.bf16.msra.mxu1 %v6261_v19 }
  0x3a   : > { %5359 = vmatprep.subr.bf16.mxu1 %v6265_v20 }
  0x3d   : > { %5361 = vmatpush3.bf16.msra.mxu1 %v6282_v26 }
  0x3e   : > { %5363 = vmatprep.subr.bf16.mxu1 %v6287_v28 }
  0x41   : > { %5365 = vmatpush3.bf16.msra.mxu1 %v6303_v33 }
  0x42   : > { %5367 = vmatprep.subr.bf16.mxu1 %v6307_v34 }
  0x45   : > { %5369 = vmatpush3.bf16.msra.mxu1 %v6323_v39 }
  0x46   : > { %5371 = vmatprep.subr.bf16.mxu1 %v6327_v40 }
  0x49   : > { %5373 = vmatpush3.bf16.msra.mxu1 %v6343_v45 }
  0x4a   : > { %5375 = vmatprep.subr.bf16.mxu1 %v6347_v46 }
  0x4d   : > { %5377 = vmatpush3.bf16.msra.mxu1 %v6357_v49 }
  0x4e   : > { %5419 = vmatprep.subr.bf16.mxu1 %v6205_v3 }
  0x50   : > { %778 = vmatmul.mubr.f32.vlgmr.msra.gmra.mrb[4].mxu1 %v4265_v57 }
  0x51   : > { %782 = vmatprep.mubr.f32.mxu1 %v4268_v58  ;;  %5421 = vmatpush3.bf16.msra.mxu1 %v6216_v7 }
  0x52   : > { %5423 = vmatprep.subr.bf16.mxu1 %v6218_v8 }
  0x54   : > { %783 = vmatmul.mubr.f32.gmra.mrb[6].mxu1 %v4267_v59 }
  0x55   : > { %5425 = vmatpush3.bf16.msra.mxu1 %v6236_v13  ;;  %1121 = vmatprep.mubr.f32.mxu1 %v4282_v2 }
  0x56   : > { %5427 = vmatprep.subr.bf16.mxu1 %v6240_v14 }
  0x59   : > { %5429 = vmatpush3.bf16.msra.mxu1 %v6261_v19 }
  0x5a   : > { %5431 = vmatprep.subr.bf16.mxu1 %v6265_v20 }
  0x5d   : > { %5433 = vmatpush3.bf16.msra.mxu1 %v6282_v26 }
  0x5e   : > { %5435 = vmatprep.subr.bf16.mxu1 %v6287_v28 }
  0x61   : > { %5437 = vmatpush3.bf16.msra.mxu1 %v6303_v33 }
  0x62   : > { %5439 = vmatprep.subr.bf16.mxu1 %v6307_v34 }
  0x65   : > { %5441 = vmatpush3.bf16.msra.mxu1 %v6323_v39 }
  0x66   : > { %5443 = vmatprep.subr.bf16.mxu1 %v6327_v40 }
  0x69   : > { %5445 = vmatpush3.bf16.msra.mxu1 %v6343_v45 }
  0x6a   : > { %5447 = vmatprep.subr.bf16.mxu1 %v6347_v46 }
  0x6d   : > { %5449 = vmatpush3.bf16.msra.mxu1 %v6357_v49 }
  0x6e   : > { %5491 = vmatprep.subr.bf16.mxu1 %v6205_v3 }
  0x70   : > { %1122 = vmatmul.mubr.f32.vlgmr.msra.gmra.mrb[8].mxu1 %v4281_v4  ;;  %v4277_v4 = vld [vmem:[%s7248_s3 + $0x30] sm:$0xff] }
  0x71   : > { %1126 = vmatprep.mubr.f32.mxu1 %v4284_v5  ;;  %5493 = vmatpush3.bf16.msra.mxu1 %v6216_v7  ;;  %v4278_v5 = vld [vmem:[%s7248_s3 + $0x38] sm:$0xff] }
  0x72   : > { %5495 = vmatprep.subr.bf16.mxu1 %v6218_v8 }
  0x74   : > { %1127 = vmatmul.mubr.f32.gmra.mrb[10].mxu1 %v4283_v6 }
  0x75   : > { %5497 = vmatpush3.bf16.msra.mxu1 %v6236_v13 }
  0x76   : > { %5499 = vmatprep.subr.bf16.mxu1 %v6240_v14 }
  0x79   : > { %5501 = vmatpush3.bf16.msra.mxu1 %v6261_v19 }
  0x7a   : > { %5503 = vmatprep.subr.bf16.mxu1 %v6265_v20 }
  0x7d   : > { %5505 = vmatpush3.bf16.msra.mxu1 %v6282_v26 }
  0x7e   : > { %5507 = vmatprep.subr.bf16.mxu1 %v6287_v28 }
  0x81   : > { %5509 = vmatpush3.bf16.msra.mxu1 %v6303_v33 }
  0x82   : > { %5511 = vmatprep.subr.bf16.mxu1 %v6307_v34 }
  0x85   : > { %5513 = vmatpush3.bf16.msra.mxu1 %v6323_v39 }
  0x86   : > { %5515 = vmatprep.subr.bf16.mxu1 %v6327_v40 }
  0x89   : > { %5517 = vmatpush3.bf16.msra.mxu1 %v6343_v45 }
  0x8a   : > { %5519 = vmatprep.subr.bf16.mxu1 %v6347_v46 }
  0x8d   : > { %5521 = vmatpush3.bf16.msra.mxu1 %v6357_v49 }
  0x8e   : > { %5527 = vmatprep.subr.bf16.mxu1 %v6205_v3 }
 0x103   : > { %v4525_v9 = vpop.f32.mrb[0].mxu1  ;;  %v4487_v10 = vpop.f32.mrb[0].mxu0 }
 0x104   : > { %v4526_v12 = vpop.f32.mrb[1].mxu1  ;;  %v4488_v15 = vpop.f32.mrb[1].mxu0 }
 0x105   : > { %v4527_v16 = vadd.f32 %v4526_v12, %v4525_v9  ;;  %v4489_v17 = vadd.f32 %v4488_v15, %v4487_v10  ;;  %v5414_v9 = vpack.c.bf16 %v4278_v5, %v4277_v4 }
 0x107   : > { %v528_v18 = vadd.f32 %v4527_v16, %v6442_v11  ;;  %v4528_v21 = vpop.f32.mrb[2].mxu1  ;;  %v440_v22 = vadd.f32 %v4489_v17, %v6442_v11  ;;  %v4490_v23 = vpop.f32.mrb[2].mxu0  ;;  %v4285_v17 = vld [vmem:[%s7248_s3 + $0x40] sm:$0xff] }
 0x108   : > { %v4529_v24 = vpop.f32.mrb[3].mxu1  ;;  %v4491_v25 = vpop.f32.mrb[3].mxu0 }
 0x109   : > { %v538_v27 = vmul.f32 0.01, %v528_v18  ;;  %vm536_vm0 = vcmp.ge.f32.partialorder %v528_v18, 0.0  ;;  %v4530_v29 = vadd.f32 %v4529_v24, %v4528_v21  ;;  %v450_v30 = vmul.f32 0.01, %v440_v22 }
 0x10a   : > { %v4492_v31 = vadd.f32 %v4491_v25, %v4490_v23  ;;  %vm448_vm2 = vcmp.ge.f32.partialorder %v440_v22, 0.0  ;;  %v4297_v23 = vld [vmem:[%s6258_s29 + $0xc0] sm:$0xff]  ;;  %v4300_v24 = vld [vmem:[%s6258_s29 + $0xd8] sm:$0x1]  ;;  %v4299_v25 = vld [vmem:[%s6258_s29 + $0xd0] sm:$0x1] }
 0x10b   : > { %v540_v32 = vsel %vm536_vm0, %v528_v18, %v538_v27  ;;  %v533_v35 = vadd.f32 %v4530_v29, %v6442_v11  ;;  %v452_v42 = vsel %vm448_vm2, %v440_v22, %v450_v30  ;;  %v4286_v18 = vld [vmem:[%s7248_s3 + $0x48] sm:$0xff]  ;;  %v4305_v29 = vld [vmem:[%s6258_s29 + $0xe0] sm:$0xff]  ;;  %v4308_v30 = vld [vmem:[%s6258_s29 + $0xf8] sm:$0x1] }
 0x10c   : > { %5166 = vmatprep.mubr.msk.f32.mxu0 %vm545_vm1, %v540_v32  ;;  %v445_v41 = vadd.f32 %v4492_v31, %v6442_v11  ;;  %v6496_v21 = vpack.c.bf16 %v4286_v18, %v4285_v17  ;;  %v4298_v22 = vld [vmem:[%s6258_s29 + $0xc8] sm:$0xff]  ;;  %v4307_v31 = vld [vmem:[%s6258_s29 + $0xf0] sm:$0x1] }
 0x10d   : > { %vm537_vm3 = vcmp.ge.f32.partialorder %v533_v35, 0.0  ;;  %v539_v38 = vmul.f32 0.01, %v533_v35  ;;  %1465 = vmatprep.mubr.f32.mxu1 %v4298_v22  ;;  %v4306_v27 = vld [vmem:[%s6258_s29 + $0xe8] sm:$0xff] }
 0x10e   : > { %v451_v47 = vmul.f32 0.01, %v445_v41  ;;  %vm449_vm4 = vcmp.ge.f32.partialorder %v445_v41, 0.0  ;;  %1466 = vmatmul.mubr.f32.vlgmr.msra.gmra.mrb[12].mxu1 %v4297_v23  ;;  %v4322_v23 = vld [vmem:[%s6258_s29 + $0x128] sm:$0xff] }
 0x10f   : > { %v541_v44 = vsel %vm537_vm3, %v533_v35, %v539_v38  ;;  %5529 = vmatpush3.bf16.msra.mxu1 %v6216_v7  ;;  %1470 = vmatprep.mubr.f32.mxu1 %v4300_v24  ;;  %v4321_v24 = vld [vmem:[%s6258_s29 + $0x120] sm:$0xff] }
 0x110   : > { %5167 = vmatmul.mubr.msk.f32.vlgmr.msra.gmra.mrb[4].mxu0 %vm545_vm1, %v541_v44  ;;  %v453_v48 = vsel %vm449_vm4, %v445_v41, %v451_v47  ;;  %5531 = vmatprep.subr.bf16.mxu1 %v6218_v8 }
 0x111   : > { %5345 = vmatpush3.bf16.msra.mxu0 %v5342_v1  ;;  %5173 = vmatprep.mubr.msk.f32.mxu0 %vm545_vm1, %v452_v42  ;;  %v4275_v1 = vld [vmem:[%s6258_s29 + $0x70] sm:$0x1] }
 0x112   : > { %5379 = vmatprep.subr.bf16.mxu0 %v5378_v43  ;;  %1471 = vmatmul.mubr.f32.gmra.mrb[14].mxu1 %v4299_v25  ;;  %v4324_v25 = vld [vmem:[%s6258_s29 + $0x138] sm:$0x1] }
 0x113   : > { %5533 = vmatpush3.bf16.msra.mxu1 %v6236_v13  ;;  %1637 = vmatprep.mubr.f32.mxu1 %v4306_v27  ;;  %v4323_v27 = vld [vmem:[%s6258_s29 + $0x130] sm:$0x1] }
 0x114   : > { %5535 = vmatprep.subr.bf16.mxu1 %v6240_v14 }
 0x117   : > { %5537 = vmatpush3.bf16.msra.mxu1 %v6261_v19 }
 0x118   : > { %5174 = vmatmul.mubr.msk.f32.vlgmr.msra.gmra.mrb[4].mxu0 %vm545_vm1, %v453_v48  ;;  %5539 = vmatprep.subr.bf16.mxu1 %v6265_v20 }
 0x119   : > { %5381 = vmatpush3.bf16.msra.mxu0 %v5378_v43 }
 0x11a   : > { %5383 = vmatprep.subr.bf16.mxu0 %v6205_v3 }
 0x11b   : > { %5541 = vmatpush3.bf16.msra.mxu1 %v6282_v26 }
 0x11c   : > { %5543 = vmatprep.subr.bf16.mxu1 %v6287_v28 }
 0x11f   : > { %5545 = vmatpush3.bf16.msra.mxu1 %v6303_v33 }
 0x120   : > { %5547 = vmatprep.subr.bf16.mxu1 %v6307_v34 }
 0x123   : > { %v4571_v50 = vpop.f32.mrb[4].mxu1  ;;  %5549 = vmatpush3.bf16.msra.mxu1 %v6323_v39 }
 0x124   : > { %v4572_v51 = vpop.f32.mrb[5].mxu1  ;;  %5551 = vmatprep.subr.bf16.mxu1 %v6327_v40 }
 0x125   : > { %v4573_v52 = vadd.f32 %v4572_v51, %v4571_v50 }
 0x127   : > { %v780_v53 = vadd.f32 %v4573_v52, %v6442_v11  ;;  %v4574_v54 = vpop.f32.mrb[6].mxu1  ;;  %5553 = vmatpush3.bf16.msra.mxu1 %v6343_v45 }
 0x128   : > { %v4575_v55 = vpop.f32.mrb[7].mxu1  ;;  %5555 = vmatprep.subr.bf16.mxu1 %v6347_v46 }
 0x129   : > { %v790_v56 = vmul.f32 0.01, %v780_v53  ;;  %v4576_v57 = vadd.f32 %v4575_v55, %v4574_v54  ;;  %vm788_vm5 = vcmp.ge.f32.partialorder %v780_v53, 0.0 }
 0x12b   : > { %v785_v58 = vadd.f32 %v4576_v57, %v6442_v11  ;;  %v792_v59 = vsel %vm788_vm5, %v780_v53, %v790_v56  ;;  %5557 = vmatpush3.bf16.msra.mxu1 %v6357_v49  ;;  %v4290_v56 = vld [vmem:[%s6258_s29 + $0xa8] sm:$0xff] }
 0x12c   : > { %5180 = vmatprep.mubr.msk.f32.mxu0 %vm545_vm1, %v792_v59  ;;  %5599 = vmatprep.subr.bf16.mxu1 %v6205_v3  ;;  %v4292_v59 = vld [vmem:[%s6258_s29 + $0xb8] sm:$0x1] }
 0x12d   : > { %vm789_vm6 = vcmp.ge.f32.partialorder %v785_v58, 0.0  ;;  %v791_v60 = vmul.f32 0.01, %v785_v58 }
 0x12e   : > { %1638 = vmatmul.mubr.f32.vlgmr.msra.gmra.mrb[16].mxu1 %v4305_v29 }
 0x12f   : > { %v793_v62 = vsel %vm789_vm6, %v785_v58, %v791_v60  ;;  %1642 = vmatprep.mubr.f32.mxu1 %v4308_v30  ;;  %5601 = vmatpush3.bf16.msra.mxu1 %v6216_v7  ;;  %v4289_v58 = vld [vmem:[%s6258_s29 + $0xa0] sm:$0xff]  ;;  %v4291_v60 = vld [vmem:[%s6258_s29 + $0xb0] sm:$0x1] }
 0x130   : > { %5181 = vmatmul.mubr.msk.f32.vlgmr.msra.gmra.mrb[4].mxu0 %vm545_vm1, %v793_v62  ;;  %5603 = vmatprep.subr.bf16.mxu1 %v6218_v8 }
 0x131   : > { %5385 = vmatpush3.bf16.msra.mxu0 %v6216_v7  ;;  %949 = vmatprep.mubr.f32.mxu0 %v4274_v61 }
 0x132   : > { %5387 = vmatprep.subr.bf16.mxu0 %v6218_v8  ;;  %1643 = vmatmul.mubr.f32.gmra.mrb[18].mxu1 %v4307_v31 }
 0x133   : > { %5605 = vmatpush3.bf16.msra.mxu1 %v6236_v13  ;;  %1981 = vmatprep.mubr.f32.mxu1 %v4322_v23  ;;  %v4338_v23 = vld [vmem:[%s6258_s29 + $0x168] sm:$0xff] }
 0x134   : > { %5607 = vmatprep.subr.bf16.mxu1 %v6240_v14 }
 0x135   : > { %5389 = vmatpush3.bf16.msra.mxu0 %v6236_v13 }
 0x136   : > { %5391 = vmatprep.subr.bf16.mxu0 %v6240_v14 }
 0x137   : > { %5609 = vmatpush3.bf16.msra.mxu1 %v6261_v19 }
 0x138   : > { %5611 = vmatprep.subr.bf16.mxu1 %v6265_v20 }
 0x139   : > { %5393 = vmatpush3.bf16.msra.mxu0 %v6261_v19 }
 0x13a   : > { %5395 = vmatprep.subr.bf16.mxu0 %v6265_v20 }
 0x13b   : > { %5613 = vmatpush3.bf16.msra.mxu1 %v6282_v26 }
 0x13c   : > { %5615 = vmatprep.subr.bf16.mxu1 %v6287_v28 }
 0x13d   : > { %5397 = vmatpush3.bf16.msra.mxu0 %v6282_v26 }
 0x13e   : > { %5399 = vmatprep.subr.bf16.mxu0 %v6287_v28 }
 0x13f   : > { %5617 = vmatpush3.bf16.msra.mxu1 %v6303_v33 }
 0x140   : > { %5619 = vmatprep.subr.bf16.mxu1 %v6307_v34 }
 0x141   : > { %5401 = vmatpush3.bf16.msra.mxu0 %v6303_v33 }
 0x142   : > { %5403 = vmatprep.subr.bf16.mxu0 %v6307_v34 }
 0x143   : > { %v4655_v2 = vpop.f32.mrb[8].mxu1  ;;  %5621 = vmatpush3.bf16.msra.mxu1 %v6323_v39 }
 0x144   : > { %v4656_v6 = vpop.f32.mrb[9].mxu1  ;;  %5623 = vmatprep.subr.bf16.mxu1 %v6327_v40 }
 0x145   : > { %5405 = vmatpush3.bf16.msra.mxu0 %v6323_v39  ;;  %v4657_v10 = vadd.f32 %v4656_v6, %v4655_v2 }
 0x146   : > { %5407 = vmatprep.subr.bf16.mxu0 %v6327_v40 }
 0x147   : > { %v4658_v12 = vpop.f32.mrb[10].mxu1  ;;  %5625 = vmatpush3.bf16.msra.mxu1 %v6343_v45  ;;  %v1124_v37 = vadd.f32 %v4657_v10, %v6442_v11  ;;  %v4302_v10 = vld [vmem:[%s7248_s3 + $0x68] sm:$0xff] }
 0x148   : > { %v4659_v15 = vpop.f32.mrb[11].mxu1  ;;  %5627 = vmatprep.subr.bf16.mxu1 %v6347_v46 }
 0x149   : > { %5409 = vmatpush3.bf16.msra.mxu0 %v6343_v45  ;;  %v6488_v16 = vadd.f32 %v4659_v15, %v4658_v12  ;;  %v1134_v47 = vmul.f32 0.01, %v1124_v37  ;;  %vm1132_vm8 = vcmp.ge.f32.partialorder %v1124_v37, 0.0 }
 0x14a   : > { %5411 = vmatprep.subr.bf16.mxu0 %v6347_v46 }
 0x14b   : > { %5629 = vmatpush3.bf16.msra.mxu1 %v6357_v49  ;;  %v1136_v52 = vsel %vm1132_vm8, %v1124_v37, %v1134_v47  ;;  %v1129_v54 = vadd.f32 %v6488_v16, %v6442_v11  ;;  %v4310_v47 = vld [vmem:[%s7248_s3 + $0x78] sm:$0xff] }
 0x14c   : > { %5671 = vmatprep.subr.bf16.mxu1 %v6205_v3 }
 0x14d   : > { %5413 = vmatpush3.bf16.msra.mxu0 %v6357_v49  ;;  %v1135_v55 = vmul.f32 0.01, %v1129_v54  ;;  %vm1133_vm10 = vcmp.ge.f32.partialorder %v1129_v54, 0.0 }
 0x14e   : > { %5415 = vmatprep.subr.bf16.mxu0 %v5414_v9  ;;  %1982 = vmatmul.mubr.f32.vlgmr.msra.gmra.mrb[20].mxu1 %v4321_v24  ;;  %v4337_v24 = vld [vmem:[%s6258_s29 + $0x160] sm:$0xff] }
 0x14f   : > { %v1137_v57 = vsel %vm1133_vm10, %v1129_v54, %v1135_v55  ;;  %1986 = vmatprep.mubr.f32.mxu1 %v4324_v25  ;;  %5673 = vmatpush3.bf16.msra.mxu1 %v6216_v7  ;;  %v4340_v25 = vld [vmem:[%s6258_s29 + $0x178] sm:$0x1] }
 0x150   : > { %950 = vmatmul.mubr.f32.vlgmr.msra.gmra.mrb[6].mxu0 %v4273_v63  ;;  %5675 = vmatprep.subr.bf16.mxu1 %v6218_v8 }
 0x151   : > { %954 = vmatprep.mubr.f32.mxu0 %v4276_v0  ;;  %5417 = vmatpush3.bf16.msra.mxu0 %v5414_v9  ;;  %v4293_v0 = vld [vmem:[%s7248_s3 + $0x50] sm:$0xff]  ;;  %v4301_v9 = vld [vmem:[%s7248_s3 + $0x60] sm:$0xff] }
 0x152   : > { %5451 = vmatprep.subr.bf16.mxu0 %v6496_v21  ;;  %v5522_v12 = vpack.c.bf16 %v4302_v10, %v4301_v9  ;;  %1987 = vmatmul.mubr.f32.gmra.mrb[22].mxu1 %v4323_v27  ;;  %v4339_v27 = vld [vmem:[%s6258_s29 + $0x170] sm:$0x1] }
 0x153   : > { %5677 = vmatpush3.bf16.msra.mxu1 %v6236_v13  ;;  %2325 = vmatprep.mubr.f32.mxu1 %v4338_v23 }
 0x154   : > { %955 = vmatmul.mubr.f32.gmra.mrb[8].mxu0 %v4275_v1  ;;  %v4294_v1 = vld [vmem:[%s7248_s3 + $0x58] sm:$0xff]  ;;  %5679 = vmatprep.subr.bf16.mxu1 %v6240_v14 }
 0x155   : > { %v5486_v2 = vpack.c.bf16 %v4294_v1, %v4293_v0  ;;  %v4313_v0 = vld [vmem:[%s6258_s29 + $0x100] sm:$0xff]  ;;  %v4316_v1 = vld [vmem:[%s6258_s29 + $0x118] sm:$0x1] }
 0x157   : > { %5681 = vmatpush3.bf16.msra.mxu1 %v6261_v19 }
 0x158   : > { %5683 = vmatprep.subr.bf16.mxu1 %v6265_v20 }
 0x15b   : > { %5685 = vmatpush3.bf16.msra.mxu1 %v6282_v26 }
 0x15c   : > { %5687 = vmatprep.subr.bf16.mxu1 %v6287_v28 }
 0x15f   : > { %5689 = vmatpush3.bf16.msra.mxu1 %v6303_v33 }
 0x160   : > { %5691 = vmatprep.subr.bf16.mxu1 %v6307_v34 }
 0x163   : > { %5693 = vmatpush3.bf16.msra.mxu1 %v6323_v39 }
 0x164   : > { %5695 = vmatprep.subr.bf16.mxu1 %v6327_v40 }
 0x167   : > { %5697 = vmatpush3.bf16.msra.mxu1 %v6343_v45 }
 0x168   : > { %5699 = vmatprep.subr.bf16.mxu1 %v6347_v46 }
 0x16b   : > { %5701 = vmatpush3.bf16.msra.mxu1 %v6357_v49 }
 0x16c   : > { %5707 = vmatprep.subr.bf16.mxu1 %v6205_v3 }
 0x16e   : > { %2326 = vmatmul.mubr.f32.vlgmr.msra.gmra.mrb[24].mxu1 %v4337_v24  ;;  %v4362_v24 = vld [vmem:[%s6258_s29 + $0x1c8] sm:$0xff] }
 0x16f   : > { %5709 = vmatpush3.bf16.msra.mxu1 %v6216_v7  ;;  %2330 = vmatprep.mubr.f32.mxu1 %v4340_v25  ;;  %v4361_v25 = vld [vmem:[%s6258_s29 + $0x1c0] sm:$0xff] }
 0x170   : > { %5711 = vmatprep.subr.bf16.mxu1 %v6218_v8 }
 0x172   : > { %2331 = vmatmul.mubr.f32.gmra.mrb[26].mxu1 %v4339_v27  ;;  %v4364_v27 = vld [vmem:[%s6258_s29 + $0x1d8] sm:$0x1] }
 0x173   : > { %5713 = vmatpush3.bf16.msra.mxu1 %v6236_v13 }
 0x174   : > { %5715 = vmatprep.subr.bf16.mxu1 %v6240_v14 }
 0x177   : > { %5717 = vmatpush3.bf16.msra.mxu1 %v6261_v19 }
 0x178   : > { %5719 = vmatprep.subr.bf16.mxu1 %v6265_v20 }
 0x17b   : > { %5721 = vmatpush3.bf16.msra.mxu1 %v6282_v26 }
 0x17c   : > { %5723 = vmatprep.subr.bf16.mxu1 %v6287_v28 }
 0x17f   : > { %5725 = vmatpush3.bf16.msra.mxu1 %v6303_v33 }
 0x180   : > { %5727 = vmatprep.subr.bf16.mxu1 %v6307_v34 }
 0x183   : > { %5729 = vmatpush3.bf16.msra.mxu1 %v6323_v39 }
 0x184   : > { %5731 = vmatprep.subr.bf16.mxu1 %v6327_v40 }
 0x187   : > { %5733 = vmatpush3.bf16.msra.mxu1 %v6343_v45 }
 0x188   : > { %5735 = vmatprep.subr.bf16.mxu1 %v6347_v46 }
 0x18b   : > { %5737 = vmatpush3.bf16.msra.mxu1 %v6357_v49 }
 0x18c   : > { %5779 = vmatprep.subr.bf16.mxu1 %v6205_v3 }
 0x1e1   : > { %v4739_v61 = vpop.f32.mrb[12].mxu1 }
 0x1e2   : > { %v4740_v62 = vpop.f32.mrb[13].mxu1 }
 0x1e3   : > { %v4741_v63 = vadd.f32 %v4740_v62, %v4739_v61  ;;  %v4314_v62 = vld [vmem:[%s6258_s29 + $0x108] sm:$0xff] }
 0x1e5   : > { %v4742_v4 = vpop.f32.mrb[14].mxu1 }
 0x1e6   : > { %v4743_v5 = vpop.f32.mrb[15].mxu1 }
 0x1e7   : > { %v4744_v6 = vadd.f32 %v4743_v5, %v4742_v4  ;;  %v4317_v5 = vld [vmem:[%s7248_s3 + $0x80] sm:$0xff] }
 0x1e9   : > { %v1473_v54 = vadd.f32 %v4744_v6, %v6442_v11  ;;  %v4318_v6 = vld [vmem:[%s7248_s3 + $0x88] sm:$0xff] }
 0x1ea   : > { %v5594_v10 = vpack.c.bf16 %v4318_v6, %v4317_v5 }
 0x1eb   : > { %vm1477_vm15 = vcmp.ge.f32.partialorder %v1473_v54, 0.0 }
 0x201   : > { %v4781_v15 = vpop.f32.mrb[16].mxu1 }
 0x202   : > { %v4782_v16 = vpop.f32.mrb[17].mxu1 }
 0x203   : > { %v4783_v17 = vadd.f32 %v4782_v16, %v4781_v15 }
 0x205   : > { %v4784_v18 = vpop.f32.mrb[18].mxu1 }
 0x223   : > { %v4613_v32 = vpop.f32.mrb[6].mxu0 }
 0x224   : > { %v4614_v35 = vpop.f32.mrb[7].mxu0 }
 0x225   : > { %v4615_v36 = vadd.f32 %v4614_v35, %v4613_v32 }
 0x227   : > { %v952_v38 = vadd.f32 %v4615_v36, %v6442_v11  ;;  %v4616_v41 = vpop.f32.mrb[8].mxu0  ;;  %v1468_v36 = vadd.f32 %v4741_v63, %v6442_v11 }
 0x228   : > { %v4617_v42 = vpop.f32.mrb[9].mxu0 }
 0x229   : > { %v962_v43 = vmul.f32 0.01, %v952_v38  ;;  %v4618_v44 = vadd.f32 %v4617_v42, %v4616_v41  ;;  %vm960_vm7 = vcmp.ge.f32.partialorder %v952_v38, 0.0  ;;  %vm1476_vm13 = vcmp.ge.f32.partialorder %v1468_v36, 0.0 }
 0x22b   : > { %v957_v48 = vadd.f32 %v4618_v44, %v6442_v11  ;;  %v964_v50 = vsel %vm960_vm7, %v952_v38, %v962_v43  ;;  %v4309_v44 = vld [vmem:[%s7248_s3 + $0x70] sm:$0xff] }
 0x22c   : > { %5187 = vmatprep.mubr.msk.f32.mxu0 %vm545_vm1, %v964_v50 }
 0x22d   : > { %vm961_vm9 = vcmp.ge.f32.partialorder %v957_v48, 0.0  ;;  %v963_v51 = vmul.f32 0.01, %v957_v48 }
 0x22f   : > { %v965_v53 = vsel %vm961_vm9, %v957_v48, %v963_v51  ;;  %v1478_v48 = vmul.f32 0.01, %v1468_v36  ;;  %v1640_v51 = vadd.f32 %v4783_v17, %v6442_v11 }
 0x230   : > { %5188 = vmatmul.mubr.msk.f32.vlgmr.msra.gmra.mrb[4].mxu0 %vm545_vm1, %v965_v53 }
 0x231   : > { %5453 = vmatpush3.bf16.msra.mxu0 %v6496_v21  ;;  %5194 = vmatprep.mubr.msk.f32.mxu0 %vm545_vm1, %v1136_v52  ;;  %v4785_v21 = vpop.f32.mrb[19].mxu1  ;;  %v5558_v52 = vpack.c.bf16 %v4310_v47, %v4309_v44  ;;  %v1480_v55 = vsel %vm1476_vm13, %v1468_v36, %v1478_v48  ;;  %vm1648_vm14 = vcmp.ge.f32.partialorder %v1640_v51, 0.0 }
 0x232   : > { %5455 = vmatprep.subr.bf16.mxu0 %v6205_v3  ;;  %v4786_v22 = vadd.f32 %v4785_v21, %v4784_v18  ;;  %v4865_v4 = vpop.f32.mrb[20].mxu1  ;;  %v4325_v18 = vld [vmem:[%s7248_s3 + $0x90] sm:$0xff]  ;;  %v4326_v21 = vld [vmem:[%s7248_s3 + $0x98] sm:$0xff] }
 0x233   : > { %v4866_v9 = vpop.f32.mrb[21].mxu1 }
 0x234   : > { %v4868_v15 = vpop.f32.mrb[22].mxu1 }
 0x235   : > { %v4869_v16 = vpop.f32.mrb[23].mxu1 }
 0x236   : > { %v6645_v17 = vadd.f32 %v4869_v16, %v4868_v15 }
 0x238   : > { %5195 = vmatmul.mubr.msk.f32.vlgmr.msra.gmra.mrb[4].mxu0 %vm545_vm1, %v1137_v57  ;;  %v1479_v57 = vmul.f32 0.01, %v1473_v54 }
 0x239   : > { %5457 = vmatpush3.bf16.msra.mxu0 %v6216_v7  ;;  %1293 = vmatprep.mubr.f32.mxu0 %v4290_v56  ;;  %v1650_v56 = vmul.f32 0.01, %v1640_v51 }
 0x23a   : > { %5459 = vmatprep.subr.bf16.mxu0 %v6218_v8 }
 0x23d   : > { %5461 = vmatpush3.bf16.msra.mxu0 %v6236_v13 }
 0x23e   : > { %5463 = vmatprep.subr.bf16.mxu0 %v6240_v14 }
 0x241   : > { %5465 = vmatpush3.bf16.msra.mxu0 %v6261_v19 }
 0x242   : > { %5467 = vmatprep.subr.bf16.mxu0 %v6265_v20 }
 0x245   : > { %5469 = vmatpush3.bf16.msra.mxu0 %v6282_v26 }
 0x246   : > { %5471 = vmatprep.subr.bf16.mxu0 %v6287_v28 }
 0x249   : > { %5473 = vmatpush3.bf16.msra.mxu0 %v6303_v33 }
 0x24a   : > { %5475 = vmatprep.subr.bf16.mxu0 %v6307_v34 }
 0x24d   : > { %5477 = vmatpush3.bf16.msra.mxu0 %v6323_v39 }
 0x24e   : > { %5479 = vmatprep.subr.bf16.mxu0 %v6327_v40 }
 0x251   : > { %5481 = vmatpush3.bf16.msra.mxu0 %v6343_v45 }
 0x252   : > { %5483 = vmatprep.subr.bf16.mxu0 %v6347_v46 }
 0x255   : > { %5485 = vmatpush3.bf16.msra.mxu0 %v6357_v49 }
 0x256   : > { %5487 = vmatprep.subr.bf16.mxu0 %v5486_v2 }
 0x258   : > { %1294 = vmatmul.mubr.f32.vlgmr.msra.gmra.mrb[10].mxu0 %v4289_v58  ;;  %v1652_v58 = vsel %vm1648_vm14, %v1640_v51, %v1650_v56 }
 0x259   : > { %1298 = vmatprep.mubr.f32.mxu0 %v4292_v59  ;;  %5489 = vmatpush3.bf16.msra.mxu0 %v5486_v2  ;;  %v1645_v59 = vadd.f32 %v4786_v22, %v6442_v11  ;;  %v4315_v2 = vld [vmem:[%s6258_s29 + $0x110] sm:$0x1]  ;;  %v6653_v22 = vpack.c.bf16 %v4326_v21, %v4325_v18 }
 0x25a   : > { %5523 = vmatprep.subr.bf16.mxu0 %v5522_v12 }
 0x25b   : > { %v1651_v61 = vmul.f32 0.01, %v1645_v59  ;;  %vm1649_vm0 = vcmp.ge.f32.partialorder %v1645_v59, 0.0 }
 0x25c   : > { %1299 = vmatmul.mubr.f32.gmra.mrb[12].mxu0 %v4291_v60  ;;  %v1481_v60 = vsel %vm1477_vm15, %v1473_v54, %v1479_v57  ;;  %v4330_v57 = vld [vmem:[%s6258_s29 + $0x148] sm:$0xff] }
 0x25d   : > { %v1653_v63 = vsel %vm1649_vm0, %v1645_v59, %v1651_v61  ;;  %v4329_v59 = vld [vmem:[%s6258_s29 + $0x140] sm:$0xff]  ;;  %v4331_v61 = vld [vmem:[%s6258_s29 + $0x150] sm:$0x1] }
 0x32b   : > { %v4697_v29 = vpop.f32.mrb[10].mxu0 }
 0x32c   : > { %v4698_v30 = vpop.f32.mrb[11].mxu0 }
 0x32d   : > { %v4699_v31 = vadd.f32 %v4698_v30, %v4697_v29  ;;  %v4346_v29 = vld [vmem:[%s6258_s29 + $0x188] sm:$0xff]  ;;  %v4345_v30 = vld [vmem:[%s6258_s29 + $0x180] sm:$0xff] }
 0x32e   : > { %2497 = vmatprep.mubr.f32.mxu1 %v4346_v29  ;;  %v4363_v29 = vld [vmem:[%s6258_s29 + $0x1d0] sm:$0x1] }
 0x32f   : > { %v1296_v32 = vadd.f32 %v4699_v31, %v6442_v11  ;;  %v4700_v35 = vpop.f32.mrb[12].mxu0  ;;  %v4348_v31 = vld [vmem:[%s6258_s29 + $0x198] sm:$0x1]  ;;  %2498 = vmatmul.mubr.f32.vlgmr.msra.gmra.mrb[28].mxu1 %v4345_v30 }
 0x330   : > { %v4701_v37 = vpop.f32.mrb[13].mxu0  ;;  %2502 = vmatprep.mubr.f32.mxu1 %v4348_v31  ;;  %5781 = vmatpush3.bf16.msra.mxu1 %v6216_v7 }
 0x331   : > { %v1306_v38 = vmul.f32 0.01, %v1296_v32  ;;  %v4702_v41 = vadd.f32 %v4701_v37, %v4700_v35  ;;  %vm1304_vm11 = vcmp.ge.f32.partialorder %v1296_v32, 0.0  ;;  %5783 = vmatprep.subr.bf16.mxu1 %v6218_v8 }
 0x333   : > { %v1301_v42 = vadd.f32 %v4702_v41, %v6442_v11  ;;  %v1308_v43 = vsel %vm1304_vm11, %v1296_v32, %v1306_v38  ;;  %v4347_v32 = vld [vmem:[%s6258_s29 + $0x190] sm:$0x1] }
 0x334   : > { %5201 = vmatprep.mubr.msk.f32.mxu0 %vm545_vm1, %v1308_v43  ;;  %2503 = vmatmul.mubr.f32.gmra.mrb[30].mxu1 %v4347_v32 }
 0x335   : > { %vm1305_vm12 = vcmp.ge.f32.partialorder %v1301_v42, 0.0  ;;  %v1307_v50 = vmul.f32 0.01, %v1301_v42  ;;  %5785 = vmatpush3.bf16.msra.mxu1 %v6236_v13  ;;  %2841 = vmatprep.mubr.f32.mxu1 %v4362_v24 }
 0x336   : > { %5787 = vmatprep.subr.bf16.mxu1 %v6240_v14 }
 0x337   : > { %v1309_v53 = vsel %vm1305_vm12, %v1301_v42, %v1307_v50 }
 0x338   : > { %5202 = vmatmul.mubr.msk.f32.vlgmr.msra.gmra.mrb[4].mxu0 %vm545_vm1, %v1309_v53 }
 0x339   : > { %5525 = vmatpush3.bf16.msra.mxu0 %v5522_v12  ;;  %5208 = vmatprep.mubr.msk.f32.mxu0 %vm545_vm1, %v1480_v55  ;;  %v4867_v12 = vadd.f32 %v4866_v9, %v4865_v4  ;;  %v1989_v55 = vadd.f32 %v6645_v17, %v6442_v11 }
 0x33a   : > { %5559 = vmatprep.subr.bf16.mxu0 %v5558_v52  ;;  %5789 = vmatpush3.bf16.msra.mxu1 %v6261_v19 }
 0x33b   : > { %5791 = vmatprep.subr.bf16.mxu1 %v6265_v20  ;;  %v1984_v38 = vadd.f32 %v4867_v12, %v6442_v11  ;;  %v1995_v56 = vmul.f32 0.01, %v1989_v55  ;;  %vm1993_vm5 = vcmp.ge.f32.partialorder %v1989_v55, 0.0  ;;  %v4342_v12 = vld [vmem:[%s7248_s3 + $0xb8] sm:$0xff] }
 0x33d   : > { %v1994_v48 = vmul.f32 0.01, %v1984_v38  ;;  %vm1992_vm3 = vcmp.ge.f32.partialorder %v1984_v38, 0.0 }
 0x33e   : > { %5793 = vmatpush3.bf16.msra.mxu1 %v6282_v26 }
 0x33f   : > { %5795 = vmatprep.subr.bf16.mxu1 %v6287_v28  ;;  %v1996_v53 = vsel %vm1992_vm3, %v1984_v38, %v1994_v48  ;;  %v4350_v48 = vld [vmem:[%s7248_s3 + $0xc8] sm:$0xff]  ;;  %vm3140_vm3 = vcmask 261120  }
 0x340   : > { %5209 = vmatmul.mubr.msk.f32.vlgmr.msra.gmra.mrb[4].mxu0 %vm545_vm1, %v1481_v60  ;;  %v4332_v60 = vld [vmem:[%s6258_s29 + $0x158] sm:$0x1] }
 0x341   : > { %5561 = vmatpush3.bf16.msra.mxu0 %v5558_v52  ;;  %5215 = vmatprep.mubr.msk.f32.mxu0 %vm545_vm1, %v1652_v58  ;;  %v1997_v58 = vsel %vm1993_vm5, %v1989_v55, %v1995_v56 }
 0x342   : > { %5563 = vmatprep.subr.bf16.mxu0 %v6205_v3  ;;  %5797 = vmatpush3.bf16.msra.mxu1 %v6303_v33 }
 0x343   : > { %5799 = vmatprep.subr.bf16.mxu1 %v6307_v34 }
 0x346   : > { %5801 = vmatpush3.bf16.msra.mxu1 %v6323_v39 }
 0x347   : > { %5803 = vmatprep.subr.bf16.mxu1 %v6327_v40 }
 0x348   : > { %5216 = vmatmul.mubr.msk.f32.vlgmr.msra.gmra.mrb[4].mxu0 %vm545_vm1, %v1653_v63 }
 0x349   : > { %5565 = vmatpush3.bf16.msra.mxu0 %v6216_v7  ;;  %1809 = vmatprep.mubr.f32.mxu0 %v4314_v62  ;;  %v4949_v62 = vpop.f32.mrb[24].mxu1 }
 0x34a   : > { %5567 = vmatprep.subr.bf16.mxu0 %v6218_v8  ;;  %5805 = vmatpush3.bf16.msra.mxu1 %v6343_v45  ;;  %v4950_v63 = vpop.f32.mrb[25].mxu1 }
 0x34b   : > { %5807 = vmatprep.subr.bf16.mxu1 %v6347_v46  ;;  %v4952_v5 = vpop.f32.mrb[26].mxu1 }
 0x34c   : > { %v4953_v6 = vpop.f32.mrb[27].mxu1 }
 0x34d   : > { %5569 = vmatpush3.bf16.msra.mxu0 %v6236_v13  ;;  %v4954_v9 = vadd.f32 %v4953_v6, %v4952_v5  ;;  %v4357_v5 = vld [vmem:[%s7248_s3 + $0xd0] sm:$0xff]  ;;  %v4358_v6 = vld [vmem:[%s7248_s3 + $0xd8] sm:$0xff] }
 0x34e   : > { %5571 = vmatprep.subr.bf16.mxu0 %v6240_v14  ;;  %5809 = vmatpush3.bf16.msra.mxu1 %v6357_v49 }
 0x34f   : > { %v2333_v55 = vadd.f32 %v4954_v9, %v6442_v11 }
 0x351   : > { %5573 = vmatpush3.bf16.msra.mxu0 %v6261_v19  ;;  %2842 = vmatmul.mubr.f32.vlgmr.msra.gmra.mrb[32].mxu1 %v4361_v25  ;;  %vm2337_vm10 = vcmp.ge.f32.partialorder %v2333_v55, 0.0 }
 0x352   : > { %5575 = vmatprep.subr.bf16.mxu0 %v6265_v20  ;;  %2846 = vmatprep.mubr.f32.mxu1 %v4364_v27  ;;  %v6794_v27 = vld [vmem:[%s7247_s2] ss:$0 sm:$0xff] }
 0x355   : > { %5577 = vmatpush3.bf16.msra.mxu0 %v6282_v26  ;;  %2847 = vmatmul.mubr.f32.gmra.mrb[34].mxu1 %v4363_v29 }
 0x356   : > { %5579 = vmatprep.subr.bf16.mxu0 %v6287_v28 }
 0x359   : > { %5581 = vmatpush3.bf16.msra.mxu0 %v6303_v33 }
 0x35a   : > { %5583 = vmatprep.subr.bf16.mxu0 %v6307_v34 }
 0x35d   : > { %5585 = vmatpush3.bf16.msra.mxu0 %v6323_v39 }
 0x35e   : > { %5587 = vmatprep.subr.bf16.mxu0 %v6327_v40 }
 0x361   : > { %5589 = vmatpush3.bf16.msra.mxu0 %v6343_v45 }
 0x362   : > { %5591 = vmatprep.subr.bf16.mxu0 %v6347_v46 }
 0x365   : > { %5593 = vmatpush3.bf16.msra.mxu0 %v6357_v49 }
 0x366   : > { %5595 = vmatprep.subr.bf16.mxu0 %v5594_v10 }
 0x368   : > { %1810 = vmatmul.mubr.f32.vlgmr.msra.gmra.mrb[14].mxu0 %v4313_v0  ;;  %v4951_v0 = vadd.f32 %v4950_v63, %v4949_v62  ;;  %v4354_v63 = vld [vmem:[%s6258_s29 + $0x1a8] sm:$0xff] }
 0x369   : > { %1814 = vmatprep.mubr.f32.mxu0 %v4316_v1  ;;  %5597 = vmatpush3.bf16.msra.mxu0 %v5594_v10  ;;  %v4333_v1 = vld [vmem:[%s7248_s3 + $0xa0] sm:$0xff]  ;;  %v4341_v10 = vld [vmem:[%s7248_s3 + $0xb0] sm:$0xff] }
 0x36a   : > { %5631 = vmatprep.subr.bf16.mxu0 %v6653_v22  ;;  %v5702_v15 = vpack.c.bf16 %v4342_v12, %v4341_v10  ;;  %v5774_v10 = vpack.c.bf16 %v4358_v6, %v4357_v5  ;;  %v3136_v5 = vld [vmem:[%s7250_s5 + $0x20] sm:$0xff]  ;;  %v3138_v6 = vld [vmem:[%s7250_s5 + $0x30] sm:$0xff] }
 0x36c   : > { %1815 = vmatmul.mubr.f32.gmra.mrb[16].mxu0 %v4315_v2  ;;  %v4334_v2 = vld [vmem:[%s7248_s3 + $0xa8] sm:$0xff] }
 0x36d   : > { %v5666_v4 = vpack.c.bf16 %v4334_v2, %v4333_v1  ;;  %v4356_v1 = vld [vmem:[%s6258_s29 + $0x1b8] sm:$0x1]  ;;  %v4355_v2 = vld [vmem:[%s6258_s29 + $0x1b0] sm:$0x1] }
 0x402   : > { %v4991_v16 = vpop.f32.mrb[28].mxu1 }
 0x403   : > { %v4992_v17 = vpop.f32.mrb[29].mxu1 }
 0x404   : > { %v4993_v18 = vadd.f32 %v4992_v17, %v4991_v16 }
 0x407   : > { %v4994_v21 = vpop.f32.mrb[30].mxu1 }
 0x43b   : > { %v4823_v35 = vpop.f32.mrb[14].mxu0 }
 0x43c   : > { %v4824_v36 = vpop.f32.mrb[15].mxu0 }
 0x43d   : > { %v4825_v37 = vadd.f32 %v4824_v36, %v4823_v35 }
 0x43f   : > { %v1812_v41 = vadd.f32 %v4825_v37, %v6442_v11  ;;  %v4826_v42 = vpop.f32.mrb[16].mxu0  ;;  %v2328_v37 = vadd.f32 %v4951_v0, %v6442_v11 }
 0x440   : > { %v4827_v43 = vpop.f32.mrb[17].mxu0 }
 0x441   : > { %v1822_v44 = vmul.f32 0.01, %v1812_v41  ;;  %v4828_v47 = vadd.f32 %v4827_v43, %v4826_v42  ;;  %vm1820_vm2 = vcmp.ge.f32.partialorder %v1812_v41, 0.0  ;;  %vm2336_vm8 = vcmp.ge.f32.partialorder %v2328_v37, 0.0 }
 0x443   : > { %v1817_v50 = vadd.f32 %v4828_v47, %v6442_v11  ;;  %v1824_v51 = vsel %vm1820_vm2, %v1812_v41, %v1822_v44  ;;  %v4349_v47 = vld [vmem:[%s7248_s3 + $0xc0] sm:$0xff] }
 0x444   : > { %5222 = vmatprep.mubr.msk.f32.mxu0 %vm545_vm1, %v1824_v51 }
 0x445   : > { %vm1821_vm4 = vcmp.ge.f32.partialorder %v1817_v50, 0.0  ;;  %v1823_v52 = vmul.f32 0.01, %v1817_v50 }
 0x447   : > { %v1825_v54 = vsel %vm1821_vm4, %v1817_v50, %v1823_v52  ;;  %v2338_v50 = vmul.f32 0.01, %v2328_v37  ;;  %v2500_v52 = vadd.f32 %v4993_v18, %v6442_v11  ;;  %v4365_v18 = vld [vmem:[%s7248_s3 + $0xe0] sm:$0xff] }
 0x448   : > { %5223 = vmatmul.mubr.msk.f32.vlgmr.msra.gmra.mrb[4].mxu0 %vm545_vm1, %v1825_v54 }
 0x449   : > { %5633 = vmatpush3.bf16.msra.mxu0 %v6653_v22  ;;  %5229 = vmatprep.mubr.msk.f32.mxu0 %vm545_vm1, %v1996_v53  ;;  %v4995_v22 = vpop.f32.mrb[31].mxu1  ;;  %v5738_v53 = vpack.c.bf16 %v4350_v48, %v4349_v47  ;;  %v2340_v56 = vsel %vm2336_vm8, %v2328_v37, %v2338_v50  ;;  %vm2508_vm9 = vcmp.ge.f32.partialorder %v2500_v52, 0.0  ;;  %v4370_v50 = vld [vmem:[%s6258_s29 + $0x1e8] sm:$0xff] }
 0x44a   : > { %5635 = vmatprep.subr.bf16.mxu0 %v6205_v3  ;;  %v4996_v23 = vadd.f32 %v4995_v22, %v4994_v21  ;;  %v4366_v21 = vld [vmem:[%s7248_s3 + $0xe8] sm:$0xff] }
 0x44b   : > { %v5810_v22 = vpack.c.bf16 %v4366_v21, %v4365_v18  ;;  %v4380_v21 = vld [vmem:[%s7250_s5 + $0x48] sm:$0xff] }
 0x450   : > { %5230 = vmatmul.mubr.msk.f32.vlgmr.msra.gmra.mrb[4].mxu0 %vm545_vm1, %v1997_v58  ;;  %v2339_v58 = vmul.f32 0.01, %v2333_v55 }
 0x451   : > { %5637 = vmatpush3.bf16.msra.mxu0 %v6216_v7  ;;  %2153 = vmatprep.mubr.f32.mxu0 %v4330_v57  ;;  %v2510_v57 = vmul.f32 0.01, %v2500_v52 }
 0x452   : > { %5639 = vmatprep.subr.bf16.mxu0 %v6218_v8 }
 0x455   : > { %5641 = vmatpush3.bf16.msra.mxu0 %v6236_v13 }
 0x456   : > { %5643 = vmatprep.subr.bf16.mxu0 %v6240_v14 }
 0x459   : > { %5645 = vmatpush3.bf16.msra.mxu0 %v6261_v19 }
 0x45a   : > { %5647 = vmatprep.subr.bf16.mxu0 %v6265_v20 }
 0x45d   : > { %5649 = vmatpush3.bf16.msra.mxu0 %v6282_v26 }
 0x45e   : > { %5651 = vmatprep.subr.bf16.mxu0 %v6287_v28 }
 0x461   : > { %5653 = vmatpush3.bf16.msra.mxu0 %v6303_v33 }
 0x462   : > { %5655 = vmatprep.subr.bf16.mxu0 %v6307_v34 }
 0x465   : > { %5657 = vmatpush3.bf16.msra.mxu0 %v6323_v39 }
 0x466   : > { %5659 = vmatprep.subr.bf16.mxu0 %v6327_v40 }
 0x469   : > { %5661 = vmatpush3.bf16.msra.mxu0 %v6343_v45 }
 0x46a   : > { %5663 = vmatprep.subr.bf16.mxu0 %v6347_v46 }
 0x46d   : > { %5665 = vmatpush3.bf16.msra.mxu0 %v6357_v49 }
 0x46e   : > { %5667 = vmatprep.subr.bf16.mxu0 %v5666_v4 }
 0x470   : > { %2154 = vmatmul.mubr.f32.vlgmr.msra.gmra.mrb[18].mxu0 %v4329_v59  ;;  %v2512_v59 = vsel %vm2508_vm9, %v2500_v52, %v2510_v57 }
 0x471   : > { %2158 = vmatprep.mubr.f32.mxu0 %v4332_v60  ;;  %5669 = vmatpush3.bf16.msra.mxu0 %v5666_v4  ;;  %v2505_v60 = vadd.f32 %v4996_v23, %v6442_v11  ;;  %v5075_v4 = vpop.f32.mrb[32].mxu1 }
 0x472   : > { %5703 = vmatprep.subr.bf16.mxu0 %v5702_v15  ;;  %v5076_v9 = vpop.f32.mrb[33].mxu1 }
 0x473   : > { %v2511_v62 = vmul.f32 0.01, %v2505_v60  ;;  %vm2509_vm11 = vcmp.ge.f32.partialorder %v2505_v60, 0.0  ;;  %v5077_v12 = vadd.f32 %v5076_v9, %v5075_v4  ;;  %v5856_v9 = vpack.c.bf16 %v3138_v6, %v3136_v5  ;;  %v4419_v6 = vld [vmem:[%s7250_s5 + $0x160] sm:$0xff] }
 0x474   : > { %2159 = vmatmul.mubr.f32.gmra.mrb[20].mxu0 %v4331_v61  ;;  %v2341_v61 = vsel %vm2337_vm10, %v2333_v55, %v2339_v58 }
 0x475   : > { %v2513_v0 = vsel %vm2509_vm11, %v2505_v60, %v2511_v62  ;;  %v2844_v29 = vadd.f32 %v6794_v27, %v5077_v12  ;;  %v4389_v60 = vld [vmem:[%s7250_s5 + $0x88] sm:$0xff]  ;;  %v4395_v12 = vld [vmem:[%s7250_s5 + $0xb8] sm:$0xff] }
 0x477   : > { %v2854_v37 = vmul.f32 0.01, %v2844_v29  ;;  %vm2852_vm13 = vcmp.ge.f32.partialorder %v2844_v29, 0.0 }
 0x543   : > { %v4907_v30 = vpop.f32.mrb[18].mxu0 }
 0x544   : > { %v4908_v31 = vpop.f32.mrb[19].mxu0 }
 0x545   : > { %v4909_v32 = vadd.f32 %v4908_v31, %v4907_v30 }
 0x547   : > { %v2156_v35 = vadd.f32 %v4909_v32, %v6442_v11  ;;  %v4910_v36 = vpop.f32.mrb[20].mxu0 }
 0x548   : > { %v4911_v38 = vpop.f32.mrb[21].mxu0 }
 0x549   : > { %v2166_v41 = vmul.f32 0.01, %v2156_v35  ;;  %v4912_v42 = vadd.f32 %v4911_v38, %v4910_v36  ;;  %vm2164_vm6 = vcmp.ge.f32.partialorder %v2156_v35, 0.0 }
 0x54b   : > { %v2161_v43 = vadd.f32 %v4912_v42, %v6442_v11  ;;  %v2168_v44 = vsel %vm2164_vm6, %v2156_v35, %v2166_v41  ;;  %v4353_v11 = vld [vmem:[%s6258_s29 + $0x1a0] sm:$0xff]  ;;  %vm4167_vm6 = vcmask 40960  }
 0x54c   : > { %5236 = vmatprep.mubr.msk.f32.mxu0 %vm545_vm1, %v2168_v44 }
 0x54d   : > { %vm2165_vm7 = vcmp.ge.f32.partialorder %v2161_v43, 0.0  ;;  %v2167_v51 = vmul.f32 0.01, %v2161_v43 }
 0x54f   : > { %v2169_v54 = vsel %vm2165_vm7, %v2161_v43, %v2167_v51  ;;  %v2856_v43 = vsel %vm2852_vm13, %v2844_v29, %v2854_v37 }
 0x550   : > { %5237 = vmatmul.mubr.msk.f32.vlgmr.msra.gmra.mrb[4].mxu0 %vm545_vm1, %v2169_v54  ;;  %v3134_v54 = vld [vmem:[%s7250_s5 + $0x10] sm:$0xff] }
 0x551   : > { %5705 = vmatpush3.bf16.msra.mxu0 %v5702_v15  ;;  %5243 = vmatprep.mubr.msk.f32.mxu0 %vm545_vm1, %v2340_v56  ;;  %v5078_v15 = vpop.f32.mrb[34].mxu1 }
 0x552   : > { %5739 = vmatprep.subr.bf16.mxu0 %v5738_v53  ;;  %v5079_v16 = vpop.f32.mrb[35].mxu1 }
 0x553   : > { %v5080_v17 = vadd.f32 %v5079_v16, %v5078_v15  ;;  %v4392_v16 = vld [vmem:[%s7250_s5 + $0xa0] sm:$0xff] }
 0x555   : > { %v2849_v47 = vadd.f32 %v6794_v27, %v5080_v17  ;;  %v4394_v17 = vld [vmem:[%s7250_s5 + $0xb0] sm:$0xff] }
 0x556   : > { %v5872_v18 = vpack.c.bf16 %v4394_v17, %v4392_v16  ;;  %v4424_v17 = vld [vmem:[%s7250_s5 + $0x180] sm:$0xff] }
 0x557   : > { %v2855_v48 = vmul.f32 0.01, %v2849_v47  ;;  %vm2853_vm15 = vcmp.ge.f32.partialorder %v2849_v47, 0.0 }
 0x558   : > { %5244 = vmatmul.mubr.msk.f32.vlgmr.msra.gmra.mrb[4].mxu0 %vm545_vm1, %v2341_v61  ;;  %v4391_v61 = vld [vmem:[%s7250_s5 + $0x98] sm:$0xff] }
 0x559   : > { %5741 = vmatpush3.bf16.msra.mxu0 %v5738_v53  ;;  %5250 = vmatprep.mubr.msk.f32.mxu0 %vm545_vm1, %v2512_v59  ;;  %v2857_v51 = vsel %vm2853_vm15, %v2849_v47, %v2855_v48  ;;  %v3132_v53 = vld [vmem:[%s7250_s5] sm:$0xff]  ;;  %v5866_v62 = vpack.c.bf16 %v4391_v61, %v4389_v60  ;;  %v4402_v48 = vld [vmem:[%s7250_s5 + $0xe8] sm:$0xff]  ;;  %v4422_v60 = vld [vmem:[%s7250_s5 + $0x178] sm:$0xff] }
 0x55a   : > { %5743 = vmatprep.subr.bf16.mxu0 %v6205_v3  ;;  %v5852_v58 = vpack.c.bf16 %v3134_v54, %v3132_v53  ;;  %v4411_v53 = vld [vmem:[%s7250_s5 + $0x128] sm:$0xff]  ;;  %v4413_v54 = vld [vmem:[%s7250_s5 + $0x138] sm:$0xff] }
 0x55b   : > { %5867 = vmatprep.subr.bf16.mxu1 %v5866_v62  ;;  %v5886_v62 = vpack.c.bf16 %v4413_v54, %v4411_v53 }
 0x560   : > { %5251 = vmatmul.mubr.msk.f32.vlgmr.msra.gmra.mrb[4].mxu0 %vm545_vm1, %v2513_v0  ;;  %v4390_v0 = vld [vmem:[%s7250_s5 + $0x90] sm:$0xff] }
 0x561   : > { %5745 = vmatpush3.bf16.msra.mxu0 %v6216_v7  ;;  %2669 = vmatprep.mubr.f32.mxu0 %v4354_v63  ;;  %v4388_v63 = vld [vmem:[%s7250_s5 + $0x80] sm:$0xff] }
 0x562   : > { %5747 = vmatprep.subr.bf16.mxu0 %v6218_v8 }
 0x565   : > { %5749 = vmatpush3.bf16.msra.mxu0 %v6236_v13 }
 0x566   : > { %5751 = vmatprep.subr.bf16.mxu0 %v6240_v14 }
 0x569   : > { %5753 = vmatpush3.bf16.msra.mxu0 %v6261_v19 }
 0x56a   : > { %5755 = vmatprep.subr.bf16.mxu0 %v6265_v20 }
 0x56d   : > { %5757 = vmatpush3.bf16.msra.mxu0 %v6282_v26 }
 0x56e   : > { %5759 = vmatprep.subr.bf16.mxu0 %v6287_v28 }
 0x571   : > { %5761 = vmatpush3.bf16.msra.mxu0 %v6303_v33 }
 0x572   : > { %5763 = vmatprep.subr.bf16.mxu0 %v6307_v34 }
 0x575   : > { %5765 = vmatpush3.bf16.msra.mxu0 %v6323_v39 }
 0x576   : > { %5767 = vmatprep.subr.bf16.mxu0 %v6327_v40 }
 0x579   : > { %5769 = vmatpush3.bf16.msra.mxu0 %v6343_v45 }
 0x57a   : > { %5771 = vmatprep.subr.bf16.mxu0 %v6347_v46 }
 0x57d   : > { %5773 = vmatpush3.bf16.msra.mxu0 %v6357_v49 }
 0x57e   : > { %5775 = vmatprep.subr.bf16.mxu0 %v5774_v10 }
 0x580   : > { %2670 = vmatmul.mubr.f32.vlgmr.msra.gmra.mrb[22].mxu0 %v4353_v11  ;;  %v5868_v11 = vpack.c.bf16 %v4390_v0, %v4388_v63  ;;  %v4410_v63 = vld [vmem:[%s7250_s5 + $0x120] sm:$0xff]  ;;  %v4412_v0 = vld [vmem:[%s7250_s5 + $0x130] sm:$0xff] }
 0x581   : > { %2674 = vmatprep.mubr.f32.mxu0 %v4356_v1  ;;  %5777 = vmatpush3.bf16.msra.mxu0 %v5774_v10  ;;  %v3137_v1 = vld [vmem:[%s7250_s5 + $0x28] sm:$0xff] }
 0x582   : > { %5811 = vmatprep.subr.bf16.mxu0 %v5810_v22  ;;  %5869 = vmatpush1.bf16.msra.mxu1 %v5868_v11  ;;  %v4393_v10 = vld [vmem:[%s7250_s5 + $0xa8] sm:$0xff] }
 0x583   : > { %v5870_v15 = vpack.c.bf16 %v4395_v12, %v4393_v10  ;;  %v5888_v10 = vpack.c.bf16 %v4412_v0, %v4410_v63  ;;  %v4434_v12 = vld [vmem:[%s7250_s5 + $0x1c8] sm:$0xff]  ;;  %v4073_v63 = vld [vmem:[%s7252_s7 + $0xa0] sm:$0xff] }
 0x584   : > { %2675 = vmatmul.mubr.f32.gmra.mrb[24].mxu0 %v4355_v2  ;;  %v3139_v2 = vld [vmem:[%s7250_s5 + $0x38] sm:$0xff]  ;;  %v4074_v0 = vld [vmem:[%s7252_s7 + $0xa8] sm:$0xff] }
 0x585   : > { %v5854_v4 = vpack.c.bf16 %v3139_v2, %v3137_v1  ;;  %5871 = vmatprep.subr.bf16.mxu1 %v5870_v15  ;;  %v4425_v1 = vld [vmem:[%s7250_s5 + $0x188] sm:$0xff]  ;;  %v4427_v2 = vld [vmem:[%s7250_s5 + $0x198] sm:$0xff] }
 0x586   : > { %5873 = vmatpush1.bf16.msra.mxu1 %v5872_v18  ;;  %v4436_v15 = vld [vmem:[%s7250_s5 + $0x1d8] sm:$0xff]  ;;  %v5898_v16 = vpack.c.bf16 %v4427_v2, %v4425_v1  ;;  %v4426_v18 = vld [vmem:[%s7250_s5 + $0x190] sm:$0xff]  ;;  %v4057_v1 = vld [vmem:[%s7252_s7 + $0x20] sm:$0xff] }
 0x587   : > { %v4058_v2 = vld [vmem:[%s7252_s7 + $0x28] sm:$0xff] }
 0x653   : > { %v5033_v23 = vpop.f32.mrb[22].mxu0 }
 0x654   : > { %v5034_v24 = vpop.f32.mrb[23].mxu0 }
 0x655   : > { %v5035_v25 = vadd.f32 %v5034_v24, %v5033_v23  ;;  %v6094_v24 = vmov 0.0  }
 0x656   : > { %3412 = vmatprep.mubr.f32.mxu1 %v6094_v24 }
 0x657   : > { %v2672_v30 = vadd.f32 %v6794_v27, %v5035_v25  ;;  %v5036_v31 = vpop.f32.mrb[24].mxu0  ;;  %v4398_v25 = vld [vmem:[%s7250_s5 + $0xc8] sm:$0xff] }
 0x658   : > { %v5037_v32 = vpop.f32.mrb[25].mxu0 }
 0x659   : > { %v2682_v35 = vmul.f32 0.01, %v2672_v30  ;;  %v5038_v36 = vadd.f32 %v5037_v32, %v5036_v31  ;;  %vm2680_vm12 = vcmp.ge.f32.partialorder %v2672_v30, 0.0 }
 0x65b   : > { %v2677_v38 = vadd.f32 %v6794_v27, %v5038_v36  ;;  %v2684_v41 = vsel %vm2680_vm12, %v2672_v30, %v2682_v35  ;;  %v6899_v30 = vld [vmem:[%s7249_s4] ss:$0 sm:$0xff]  ;;  %v4381_v36 = vld [vmem:[%s7250_s5 + $0x50] sm:$0xff] }
 0x65c   : > { %5257 = vmatprep.mubr.msk.f32.mxu0 %vm545_vm1, %v2684_v41  ;;  %v4379_v35 = vld [vmem:[%s7250_s5 + $0x40] sm:$0xff]  ;;  %v4386_v41 = vld [vmem:[%s7250_s5 + $0x78] sm:$0xff] }
 0x65d   : > { %vm2681_vm14 = vcmp.ge.f32.partialorder %v2677_v38, 0.0  ;;  %v2683_v42 = vmul.f32 0.01, %v2677_v38  ;;  %v5860_v47 = vpack.c.bf16 %v4381_v36, %v4379_v35  ;;  %v4438_v35 = vld [vmem:[%s7250_s5 + $0x1e8] sm:$0xff]  ;;  %v4440_v36 = vld [vmem:[%s7250_s5 + $0x1f8] sm:$0xff] }
 0x65f   : > { %v2685_v44 = vsel %vm2681_vm14, %v2677_v38, %v2683_v42  ;;  %v4384_v38 = vld [vmem:[%s7250_s5 + $0x68] sm:$0xff]  ;;  %v4397_v42 = vld [vmem:[%s7250_s5 + $0xc0] sm:$0xff] }
 0x660   : > { %5258 = vmatmul.mubr.msk.f32.vlgmr.msra.gmra.mrb[4].mxu0 %vm545_vm1, %v2685_v44 }
 0x661   : > { %5813 = vmatpush3.bf16.msra.mxu0 %v5810_v22  ;;  %5264 = vmatprep.mubr.msk.f32.mxu0 %vm545_vm1, %v2856_v43  ;;  %v4382_v22 = vld [vmem:[%s7250_s5 + $0x58] sm:$0xff]  ;;  %v4399_v43 = vld [vmem:[%s7250_s5 + $0xd0] sm:$0xff] }
 0x662   : > { %5815 = vmatprep.subr.bf16.mxu0 %v6205_v3  ;;  %v4369_v3 = vld [vmem:[%s6258_s29 + $0x1e0] sm:$0xff]  ;;  %v5858_v23 = vpack.c.bf16 %v4382_v22, %v4380_v21  ;;  %v4429_v22 = vld [vmem:[%s7250_s5 + $0x1a8] sm:$0xff] }
 0x668   : > { %5265 = vmatmul.mubr.msk.f32.vlgmr.msra.gmra.mrb[4].mxu0 %vm545_vm1, %v2857_v51  ;;  %v5862_v51 = vpack.c.bf16 %v4386_v41, %v4384_v38  ;;  %v4428_v41 = vld [vmem:[%s7250_s5 + $0x1a0] sm:$0xff] }
 0x669   : > { %5817 = vmatpush3.bf16.msra.mxu0 %v6216_v7  ;;  %3013 = vmatprep.mubr.f32.mxu0 %v4370_v50  ;;  %v4372_v7 = vld [vmem:[%s6258_s29 + $0x1f8] sm:$0x1] }
 0x66a   : > { %5819 = vmatprep.subr.bf16.mxu0 %v6218_v8  ;;  %v4371_v8 = vld [vmem:[%s6258_s29 + $0x1f0] sm:$0x1]  ;;  %v4404_v50 = vld [vmem:[%s7250_s5 + $0xf8] sm:$0xff]  ;;  %s7202_s29 = scalar_lea.hbm %s7254_s9, %s4451_s14 }
 0x66d   : > { %5821 = vmatpush3.bf16.msra.mxu0 %v6236_v13  ;;  %v4373_v13 = vld [vmem:[%s7248_s3 + $0xf0] sm:$0xff] }
 0x66e   : > { %5823 = vmatprep.subr.bf16.mxu0 %v6240_v14  ;;  %v4374_v14 = vld [vmem:[%s7248_s3 + $0xf8] sm:$0xff] }
 0x671   : > { %5825 = vmatpush3.bf16.msra.mxu0 %v6261_v19  ;;  %v5846_v19 = vpack.c.bf16 %v4374_v14, %v4373_v13  ;;  %v5876_v13 = vpack.c.bf16 %v4399_v43, %v4397_v42  ;;  %v4407_v14 = vld [vmem:[%s7250_s5 + $0x108] sm:$0xff]  ;;  %v4430_v42 = vld [vmem:[%s7250_s5 + $0x1b0] sm:$0xff] }
 0x672   : > { %5827 = vmatprep.subr.bf16.mxu0 %v6265_v20  ;;  %v3133_v20 = vld [vmem:[%s7250_s5 + $0x8] sm:$0xff] }
 0x675   : > { %5829 = vmatpush3.bf16.msra.mxu0 %v6282_v26  ;;  %v3135_v26 = vld [vmem:[%s7250_s5 + $0x18] sm:$0xff] }
 0x676   : > { %5831 = vmatprep.subr.bf16.mxu0 %v6287_v28  ;;  %v5850_v28 = vpack.c.bf16 %v3135_v26, %v3133_v20  ;;  %v5878_v26 = vpack.c.bf16 %v4404_v50, %v4402_v48  ;;  %v5910_v50 = vpack.c.bf16 %v4440_v36, %v4438_v35  ;;  %v4064_v35 = vld [vmem:[%s7252_s7 + $0x58] sm:$0xff] }
 0x679   : > { %5833 = vmatpush3.bf16.msra.mxu0 %v6303_v33 }
 0x67a   : > { %5835 = vmatprep.subr.bf16.mxu0 %v6307_v34 }
 0x67d   : > { %5837 = vmatpush3.bf16.msra.mxu0 %v6323_v39 }
 0x67e   : > { %5839 = vmatprep.subr.bf16.mxu0 %v6327_v40 }
 0x681   : > { %5841 = vmatpush3.bf16.msra.mxu0 %v6343_v45 }
 0x682   : > { %5843 = vmatprep.subr.bf16.mxu0 %v6347_v46 }
 0x685   : > { %5845 = vmatpush3.bf16.msra.mxu0 %v6357_v49 }
 0x686   : > { %5847 = vmatprep.subr.bf16.mxu0 %v5846_v19 }
 0x688   : > { %3014 = vmatmul.mubr.f32.vlgmr.msra.gmra.mrb[26].mxu0 %v4369_v3  ;;  %v4383_v3 = vld [vmem:[%s7250_s5 + $0x60] sm:$0xff] }
 0x689   : > { %3018 = vmatprep.mubr.f32.mxu0 %v4372_v7  ;;  %5849 = vmatpush3.bf16.msra.mxu0 %v5846_v19  ;;  %v4385_v7 = vld [vmem:[%s7250_s5 + $0x70] sm:$0xff]  ;;  %v4409_v19 = vld [vmem:[%s7250_s5 + $0x118] sm:$0xff] }
 0x68a   : > { %5851 = vmatprep.subr.bf16.mxu0 %v5850_v28  ;;  %v4401_v28 = vld [vmem:[%s7250_s5 + $0xe0] sm:$0xff] }
 0x68c   : > { %3019 = vmatmul.mubr.f32.gmra.mrb[28].mxu0 %v4371_v8 }
 0x75b   : > { %v5117_v33 = vpop.f32.mrb[26].mxu0 }
 0x75c   : > { %v5118_v34 = vpop.f32.mrb[27].mxu0 }
 0x75d   : > { %v5119_v39 = vadd.f32 %v5118_v34, %v5117_v33  ;;  %v4403_v33 = vld [vmem:[%s7250_s5 + $0xf0] sm:$0xff]  ;;  %v5864_v34 = vpack.c.bf16 %v4385_v7, %v4383_v3  ;;  %v5904_v7 = vpack.c.bf16 %v4430_v42, %v4428_v41  ;;  %v4065_v42 = vld [vmem:[%s7252_s7 + $0x60] sm:$0xff] }
 0x75e   : > { %v4439_v3 = vld [vmem:[%s7250_s5 + $0x1f0] sm:$0xff] }
 0x75f   : > { %v3016_v40 = vadd.f32 %v6794_v27, %v5119_v39  ;;  %v5120_v45 = vpop.f32.mrb[28].mxu0  ;;  %v4416_v39 = vld [vmem:[%s7250_s5 + $0x148] sm:$0xff] }
 0x760   : > { %v5121_v46 = vpop.f32.mrb[29].mxu0 }
 0x761   : > { %v3026_v49 = vmul.f32 0.01, %v3016_v40  ;;  %v5122_v52 = vadd.f32 %v5121_v46, %v5120_v45  ;;  %vm3024_vm0 = vcmp.ge.f32.partialorder %v3016_v40, 0.0  ;;  %v5882_v45 = vpack.c.bf16 %v4409_v19, %v4407_v14  ;;  %v4406_v46 = vld [vmem:[%s7250_s5 + $0x100] sm:$0xff]  ;;  %v4444_v19 = vld [vmem:[%s7250_s5 + $0x210] sm:$0xff] }
 0x762   : > { %v4442_v14 = vld [vmem:[%s7250_s5 + $0x200] sm:$0xff] }
 0x763   : > { %v3021_v55 = vadd.f32 %v6794_v27, %v5122_v52  ;;  %v3028_v56 = vsel %vm3024_vm0, %v3016_v40, %v3026_v49  ;;  %v4400_v27 = vld [vmem:[%s7250_s5 + $0xd8] sm:$0xff]  ;;  %v4408_v49 = vld [vmem:[%s7250_s5 + $0x110] sm:$0xff]  ;;  %v5880_v52 = vpack.c.bf16 %v4403_v33, %v4401_v28  ;;  %v5916_v33 = vpack.c.bf16 %v4444_v19, %v4442_v14 }
 0x764   : > { %5271 = vmatprep.mubr.msk.f32.mxu0 %vm545_vm1, %v3028_v56  ;;  %v5874_v29 = vpack.c.bf16 %v4400_v27, %v4398_v25  ;;  %v4418_v40 = vld [vmem:[%s7250_s5 + $0x158] sm:$0xff]  ;;  %v4415_v56 = vld [vmem:[%s7250_s5 + $0x140] sm:$0xff]  ;;  %v5906_v25 = vpack.c.bf16 %v4436_v15, %v4434_v12  ;;  %v3221_v19 = vlaneseq }
 0x765   : > { %vm3025_vm2 = vcmp.ge.f32.partialorder %v3021_v55, 0.0  ;;  %v3027_v57 = vmul.f32 0.01, %v3021_v55  ;;  %v4433_v27 = vld [vmem:[%s7250_s5 + $0x1c0] sm:$0xff]  ;;  %v4449_v28 = vld [vmem:[%s7250_s5 + $0x238] sm:$0xff] }
 0x766   : > { %5875 = vmatprep.subr.bf16.mxu1 %v5874_v29  ;;  %v4435_v29 = vld [vmem:[%s7250_s5 + $0x1d0] sm:$0xff]  ;;  %v4060_v12 = vld [vmem:[%s7252_s7 + $0x38] sm:$0xff] }
 0x767   : > { %v3029_v59 = vsel %vm3025_vm2, %v3021_v55, %v3027_v57  ;;  %v5890_v55 = vpack.c.bf16 %v4418_v40, %v4416_v39  ;;  %v4417_v57 = vld [vmem:[%s7250_s5 + $0x150] sm:$0xff]  ;;  %v5908_v43 = vpack.c.bf16 %v4435_v29, %v4433_v27  ;;  %v4446_v40 = vld [vmem:[%s7250_s5 + $0x220] sm:$0xff]  ;;  %v4080_v27 = vld [vmem:[%s7252_s7 + $0xd8] sm:$0xff] }
 0x768   : > { %5272 = vmatmul.mubr.msk.f32.vlgmr.msra.gmra.mrb[4].mxu0 %vm545_vm1, %v3029_v59  ;;  %v4420_v59 = vld [vmem:[%s7250_s5 + $0x168] sm:$0xff]  ;;  %v5892_v11 = vpack.c.bf16 %v4417_v57, %v4415_v56  ;;  %v4071_v57 = vld [vmem:[%s7252_s7 + $0x90] sm:$0xff] }
 0x769   : > { %5853 = vmatpush1.bf16.msra.mxu0 %v5852_v58  ;;  %3208 = vmatprep.mubr.f32.mxu0 %v6094_v24  ;;  %v5884_v58 = vpack.c.bf16 %v4408_v49, %v4406_v46  ;;  %v5894_v5 = vpack.c.bf16 %v4422_v60, %v4420_v59  ;;  %v4055_v60 = vld [vmem:[%s7252_s7 + $0x10] sm:$0xff] }
 0x76a   : > { %5855 = vmatprep.subr.bf16.mxu0 %v5854_v4 }
 0x76d   : > { %5857 = vmatpush1.bf16.msra.mxu0 %v5856_v9  ;;  %v4421_v9 = vld [vmem:[%s7250_s5 + $0x170] sm:$0xff] }
 0x76e   : > { %5859 = vmatprep.subr.bf16.mxu0 %v5858_v23  ;;  %v5896_v21 = vpack.c.bf16 %v4421_v9, %v4419_v6  ;;  %v4431_v23 = vld [vmem:[%s7250_s5 + $0x1b8] sm:$0xff] }
 0x76f   : > { %v5902_v38 = vpack.c.bf16 %v4431_v23, %v4429_v22  ;;  %v4076_v6 = vld [vmem:[%s7252_s7 + $0xb8] sm:$0xff]  ;;  %v4062_v22 = vld [vmem:[%s7252_s7 + $0x48] sm:$0xff] }
 0x83b   : > { %v6901_v31 = vpop.f32.mrb[4].mxu0 }
 0x83c   : > { %v3105_v32 = vpop.f32.mrb[5].mxu0  ;;  %v3124_v46 = vadd.f32 %v6901_v31, %v6899_v30  ;;  %v4070_v31 = vld [vmem:[%s7252_s7 + $0x88] sm:$0xff] }
 0x83d   : > { %v3123_v37 = vadd.f32 %v6899_v30, %v3105_v32  ;;  %v5900_v32 = vpack.c.bf16 %v4426_v18, %v4424_v17  ;;  %v4069_v30 = vld [vmem:[%s7252_s7 + $0x80] sm:$0xff]  ;;  %v4078_v17 = vld [vmem:[%s7252_s7 + $0xc8] sm:$0xff] }
 0x83e   : > { %v3128_v53 = vmul.f32 0.01, %v3124_v46  ;;  %vm3126_vm4 = vcmp.ge.f32.partialorder %v3124_v46, 0.0 }
 0x83f   : > { %vm3125_vm1 = vcmp.ge.f32.partialorder %v3123_v37, 0.0  ;;  %v3127_v44 = vmul.f32 0.01, %v3123_v37 }
 0x840   : > { %v3130_v54 = vsel %vm3126_vm4, %v3124_v46, %v3128_v53 }
 0x841   : > { %v6934_v8 = vsel %vm3125_vm1, %v3123_v37, %v3127_v44  ;;  %v4443_v44 = vld [vmem:[%s7250_s5 + $0x208] sm:$0xff] }
 0x842   : > { %4378 = vmatmul.mubr.msk.f32.vlgmr.msra.gmra.mrb[30].mxu0 %vm3140_vm3, %v6934_v8  ;;  %v3345_v20 = vrot.slane %v6934_v8, 2  ;;  %v3243_v61 = vrot.slane %v6934_v8, 1  ;;  %v3447_v4 = vrot.slane %v6934_v8, 3  ;;  %v3549_v37 = vrot.slane %v6934_v8, 4 }
 0x843   : > { %5861 = vmatpush1.bf16.msra.mxu0 %v5860_v47  ;;  %3310 = vmatprep.mubr.f32.mxu0 %v6094_v24  ;;  %v4445_v47 = vld [vmem:[%s7250_s5 + $0x218] sm:$0xff]  ;;  %v3651_v48 = vrot.slane %v6934_v8, 5  ;;  %v3855_v49 = vrot.slane %v6934_v8, 7 }
 0x844   : > { %4396 = vmatmul.mubr.msk.f32.vlgmr.msra.gmra.mrb[36].mxu1 %vm3140_vm3, %v3345_v20  ;;  %5863 = vmatprep.subr.bf16.mxu0 %v5862_v51  ;;  %v4437_v51 = vld [vmem:[%s7250_s5 + $0x1e0] sm:$0xff] }
 0x845   : > { %5877 = vmatpush1.bf16.msra.mxu1 %v5876_v13  ;;  %3514 = vmatprep.mubr.f32.mxu1 %v6094_v24  ;;  %v5914_v13 = vpack.c.bf16 %v4445_v47, %v4443_v44  ;;  %v5912_v20 = vpack.c.bf16 %v4439_v3, %v4437_v51  ;;  %v4083_v47 = vld [vmem:[%s7252_s7 + $0xf0] sm:$0xff]  ;;  %v4068_v3 = vld [vmem:[%s7252_s7 + $0x78] sm:$0xff] }
 0x846   : > { %5879 = vmatprep.subr.bf16.mxu1 %v5878_v26  ;;  %v4447_v26 = vld [vmem:[%s7250_s5 + $0x228] sm:$0xff] }
 0x847   : > { %5865 = vmatpush1.bf16.msra.mxu0 %v5864_v34  ;;  %v3753_v34 = vrot.slane %v6934_v8, 6  ;;  %v5918_v39 = vpack.c.bf16 %v4449_v28, %v4447_v26  ;;  %v5922_v8 = vpack.c.bf16 %v4070_v31, %v4069_v30  ;;  %v7184_v26 = vshrl.u32 %v3221_v19, 7 }
 0x848   : > { %5883 = vmatprep.subr.bf16.mxu0 %v5882_v45  ;;  %v4448_v45 = vld [vmem:[%s7250_s5 + $0x230] sm:$0xff] }
 0x849   : > { %5881 = vmatpush1.bf16.msra.mxu1 %v5880_v52  ;;  %v5920_v52 = vpack.c.bf16 %v4448_v45, %v4446_v40 }
 0x84a   : > { %4387 = vmatmul.mubr.msk.f32.vlgmr.msra.gmra.mrb[32].mxu0 %vm3140_vm3, %v3243_v61  ;;  %5891 = vmatprep.subr.bf16.mxu1 %v5890_v55  ;;  %v4054_v55 = vld [vmem:[%s7252_s7 + $0x8] sm:$0xff]  ;;  %v4056_v61 = vld [vmem:[%s7252_s7 + $0x18] sm:$0xff] }
 0x84b   : > { %5885 = vmatpush1.bf16.msra.mxu0 %v5884_v58  ;;  %3616 = vmatprep.mubr.f32.mxu0 %v6094_v24  ;;  %v4072_v58 = vld [vmem:[%s7252_s7 + $0x98] sm:$0xff] }
 0x84c   : > { %4405 = vmatmul.mubr.msk.f32.vlgmr.msra.gmra.mrb[38].mxu1 %vm3140_vm3, %v3447_v4  ;;  %5887 = vmatprep.subr.bf16.mxu0 %v5886_v62  ;;  %v5926_v59 = vpack.c.bf16 %v4072_v58, %v4071_v57  ;;  %v5928_v62 = vpack.c.bf16 %v4056_v61, %v4055_v60  ;;  %v5932_v4 = vpack.c.bf16 %v4058_v2, %v4057_v1 }
 0x84d   : > { %5893 = vmatpush1.bf16.msra.mxu1 %v5892_v11  ;;  %3718 = vmatprep.mubr.f32.mxu1 %v6094_v24  ;;  %v5930_v11 = vpack.c.bf16 %v4074_v0, %v4073_v63 }
 0x84e   : > { %5895 = vmatprep.subr.bf16.mxu1 %v5894_v5  ;;  %v4075_v5 = vld [vmem:[%s7252_s7 + $0xb0] sm:$0xff] }
 0x84f   : > { %5889 = vmatpush1.bf16.msra.mxu0 %v5888_v10  ;;  %v5934_v9 = vpack.c.bf16 %v4076_v6, %v4075_v5  ;;  %v4059_v10 = vld [vmem:[%s7252_s7 + $0x30] sm:$0xff] }
 0x850   : > { %5899 = vmatprep.subr.bf16.mxu0 %v5898_v16  ;;  %v5936_v15 = vpack.c.bf16 %v4060_v12, %v4059_v10  ;;  %v4077_v16 = vld [vmem:[%s7252_s7 + $0xc0] sm:$0xff] }
 0x851   : > { %5897 = vmatpush1.bf16.msra.mxu1 %v5896_v21  ;;  %v5938_v18 = vpack.c.bf16 %v4078_v17, %v4077_v16  ;;  %v4061_v21 = vld [vmem:[%s7252_s7 + $0x40] sm:$0xff] }
 0x852   : > { %4414 = vmatmul.mubr.msk.f32.vlgmr.msra.gmra.mrb[34].mxu0 %vm3140_vm3, %v3549_v37  ;;  %5907 = vmatprep.subr.bf16.mxu1 %v5906_v25  ;;  %v5940_v23 = vpack.c.bf16 %v4062_v22, %v4061_v21  ;;  %v4079_v25 = vld [vmem:[%s7252_s7 + $0xd0] sm:$0xff]  ;;  %v4081_v37 = vld [vmem:[%s7252_s7 + $0xe0] sm:$0xff] }
 0x853   : > { %5901 = vmatpush1.bf16.msra.mxu0 %v5900_v32  ;;  %3820 = vmatprep.mubr.f32.mxu0 %v6094_v24  ;;  %v5942_v29 = vpack.c.bf16 %v4080_v27, %v4079_v25  ;;  %v4063_v32 = vld [vmem:[%s7252_s7 + $0x50] sm:$0xff] }
 0x854   : > { %4423 = vmatmul.mubr.msk.f32.vlgmr.msra.gmra.mrb[40].mxu1 %vm3140_vm3, %v3651_v48  ;;  %5903 = vmatprep.subr.bf16.mxu0 %v5902_v38  ;;  %v5944_v36 = vpack.c.bf16 %v4064_v35, %v4063_v32  ;;  %v4082_v38 = vld [vmem:[%s7252_s7 + $0xe8] sm:$0xff]  ;;  %v4084_v48 = vld [vmem:[%s7252_s7 + $0xf8] sm:$0xff] }
 0x855   : > { %5909 = vmatpush1.bf16.msra.mxu1 %v5908_v43  ;;  %3922 = vmatprep.mubr.f32.mxu1 %v6094_v24  ;;  %v5946_v41 = vpack.c.bf16 %v4082_v38, %v4081_v37  ;;  %v4066_v43 = vld [vmem:[%s7252_s7 + $0x68] sm:$0xff]  ;;  %v5950_v51 = vpack.c.bf16 %v4084_v48, %v4083_v47 }
 0x856   : > { %5911 = vmatprep.subr.bf16.mxu1 %v5910_v50  ;;  %v5948_v44 = vpack.c.bf16 %v4066_v43, %v4065_v42  ;;  %v4067_v50 = vld [vmem:[%s7252_s7 + $0x70] sm:$0xff] }
 0x857   : > { %5905 = vmatpush1.bf16.msra.mxu0 %v5904_v7  ;;  %v5952_v7 = vpack.c.bf16 %v4068_v3, %v4067_v50  ;;  %v4093_v3 = vsub.s32 1, %v7184_v26 }
 0x858   : > { %5915 = vmatprep.subr.bf16.mxu0 %v5914_v13  ;;  %v6095_v13 = vmov 1966171168  }
 0x859   : > { %5913 = vmatpush1.bf16.msra.mxu1 %v5912_v20  ;;  %v3219_v14 = vunpack.c.l.s4 %v6095_v13 }
 0x85a   : > { %4432 = vmatmul.mubr.msk.f32.vlgmr.msra.gmra.mrb[36].mxu0 %vm3140_vm3, %v3753_v34  ;;  %5923 = vmatprep.subr.bf16.mxu1 %v5922_v8  ;;  %v3131_v8 = vld [vmem:[%s7251_s6] sm:$0x3] }
 0x85b   : > { %5917 = vmatpush1.bf16.msra.mxu0 %v5916_v33  ;;  %4024 = vmatprep.mubr.f32.mxu0 %v6094_v24  ;;  %v4053_v24 = vld [vmem:[%s7252_s7] sm:$0xff]  ;;  %v3220_v20 = vunpack.c.0.s8 %v3219_v14 }
 0x85c   : > { %4441 = vmatmul.mubr.msk.f32.vlgmr.msra.gmra.mrb[42].mxu1 %vm3140_vm3, %v3855_v49  ;;  %5919 = vmatprep.subr.bf16.mxu0 %v5918_v39  ;;  %v5924_v56 = vpack.c.bf16 %v4054_v55, %v4053_v24 }
 0x85d   : > { %v3223_v39 = vsub.s32 %v3220_v20, %v7184_v26 }
 0x85e   : > { %5925 = vmatpush3.bf16.msra.mxu1 %v5924_v56 }
 0x85f   : > { %5921 = vmatpush1.bf16.msra.mxu0 %v5920_v52  ;;  %5927 = vmatprep.subr.bf16.mxu1 %v5926_v59 }
 0x862   : > { %4450 = vmatmul.mubr.msk.f32.vlgmr.msra.gmra.mrb[38].mxu0 %vm3140_vm3, %v3130_v54  ;;  %5929 = vmatpush3.bf16.msra.mxu1 %v5928_v62 }
 0x863   : > { %5931 = vmatprep.subr.bf16.mxu1 %v5930_v11 }
 0x866   : > { %5933 = vmatpush3.bf16.msra.mxu1 %v5932_v4 }
 0x867   : > { %5935 = vmatprep.subr.bf16.mxu1 %v5934_v9 }
 0x86a   : > { %5937 = vmatpush3.bf16.msra.mxu1 %v5936_v15 }
 0x86b   : > { %5939 = vmatprep.subr.bf16.mxu1 %v5938_v18 }
 0x86e   : > { %5941 = vmatpush3.bf16.msra.mxu1 %v5940_v23 }
 0x86f   : > { %5943 = vmatprep.subr.bf16.mxu1 %v5942_v29 }
 0x872   : > { %5945 = vmatpush3.bf16.msra.mxu1 %v5944_v36 }
 0x873   : > { %5947 = vmatprep.subr.bf16.mxu1 %v5946_v41 }
 0x876   : > { %5949 = vmatpush3.bf16.msra.mxu1 %v5948_v44 }
 0x877   : > { %5951 = vmatprep.subr.bf16.mxu1 %v5950_v51  ;;  %v4089_v51 = vsub.s32 0, %v7184_v26 }
 0x87a   : > { %5953 = vmatpush3.bf16.msra.mxu1 %v5952_v7 }
 0x915   : > { %v3210_v28 = vpop.f32.mrb[30].mxu0 }
 0x916   : > { %v3212_v33 = vpop.f32.mrb[31].mxu0 }
 0x917   : > { %v3217_v34 = vcombine.low %v3210_v28, %v3212_v33  ;;  %v3414_v40 = vpop.f32.mrb[36].mxu1  ;;  %v4085_v33 = vld [vmem:[%s7253_s8] sm:$0x1] }
 0x918   : > { %v3416_v45 = vpop.f32.mrb[37].mxu1 }
 0x919   : > { %v3421_v46 = vcombine.low %v3414_v40, %v3416_v45  ;;  %v3224_v49 = vrot.slane %v3217_v34, %v3223_v39 }
 0x91b   : > { %v3231_v54 = vrot.slane %v3224_v49, %v3223_v39  ;;  %v3428_v55 = vrot.slane %v3421_v46, %v3223_v39 }
 0x91d   : > { %v3312_v52 = vpop.f32.mrb[32].mxu0  ;;  %v3233_v58 = vadd.f32 %v3231_v54, %v3131_v8  ;;  %v3435_v61 = vrot.slane %v3428_v55, %v3223_v39 }
 0x91e   : > { %v3314_v53 = vpop.f32.mrb[33].mxu0 }
 0x91f   : > { %v3319_v30 = vcombine.low %v3312_v52, %v3314_v53  ;;  %v3516_v31 = vpop.f32.mrb[38].mxu1 }
 0x920   : > { %v3518_v24 = vpop.f32.mrb[39].mxu1 }
 0x921   : > { %v3326_v56 = vrot.slane %v3319_v30, %v3223_v39  ;;  %v3523_v57 = vcombine.low %v3516_v31, %v3518_v24 }
 0x923   : > { %v3333_v59 = vrot.slane %v3326_v56, %v3223_v39  ;;  %v3530_v60 = vrot.slane %v3523_v57, %v3223_v39 }
 0x925   : > { %v3335_v62 = vadd.f32 %v3333_v59, %v3233_v58  ;;  %v3618_v63 = vpop.f32.mrb[34].mxu0  ;;  %v3537_v1 = vrot.slane %v3530_v60, %v3223_v39 }
 0x926   : > { %v3620_v0 = vpop.f32.mrb[35].mxu0 }
 0x927   : > { %v3437_v11 = vadd.f32 %v3435_v61, %v3335_v62  ;;  %v3625_v2 = vcombine.low %v3618_v63, %v3620_v0  ;;  %v3720_v4 = vpop.f32.mrb[40].mxu1 }
 0x928   : > { %v3722_v5 = vpop.f32.mrb[41].mxu1 }
 0x929   : > { %v3539_v6 = vadd.f32 %v3537_v1, %v3437_v11  ;;  %v3632_v9 = vrot.slane %v3625_v2, %v3223_v39  ;;  %v3727_v10 = vcombine.low %v3720_v4, %v3722_v5 }
 0x92b   : > { %v3639_v12 = vrot.slane %v3632_v9, %v3223_v39  ;;  %v3734_v15 = vrot.slane %v3727_v10, %v3223_v39 }
 0x92d   : > { %v3641_v16 = vadd.f32 %v3639_v12, %v3539_v6  ;;  %v3741_v17 = vrot.slane %v3734_v15, %v3223_v39  ;;  %v3822_v18 = vpop.f32.mrb[36].mxu0 }
 0x92e   : > { %v3824_v21 = vpop.f32.mrb[37].mxu0 }
 0x92f   : > { %v3743_v22 = vadd.f32 %v3741_v17, %v3641_v16  ;;  %v3829_v23 = vcombine.low %v3822_v18, %v3824_v21  ;;  %v3924_v25 = vpop.f32.mrb[42].mxu1 }
 0x930   : > { %v3926_v27 = vpop.f32.mrb[43].mxu1 }
 0x931   : > { %v3836_v29 = vrot.slane %v3829_v23, %v3223_v39  ;;  %v3931_v32 = vcombine.low %v3924_v25, %v3926_v27 }
 0x933   : > { %v3843_v35 = vrot.slane %v3836_v29, %v3223_v39  ;;  %v3938_v36 = vrot.slane %v3931_v32, %v3223_v39 }
 0x935   : > { %v3845_v37 = vadd.f32 %v3843_v35, %v3743_v22  ;;  %v3945_v38 = vrot.slane %v3938_v36, %v3223_v39  ;;  %v4026_v41 = vpop.f32.mrb[38].mxu0 }
 0x936   : > { %v4028_v42 = vpop.f32.mrb[39].mxu0 }
 0x937   : > { %v3947_v43 = vadd.f32 %v3945_v38, %v3845_v37  ;;  %v4033_v44 = vcombine.low %v4026_v41, %v4028_v42 }
 0x939   : > { %v4040_v47 = vrot.slane %v4033_v44, %v3223_v39 }
 0x93b   : > { %v4047_v48 = vrot.slane %v4040_v47, %v3223_v39 }
 0x93d   : > { %v4049_v50 = vadd.f32 %v4047_v48, %v3947_v43 }
 0x93f   : > { %vm4050_vm5 = vcmp.ge.f32.partialorder %v4049_v50, 0.0  ;;  %v4051_v7 = vmul.f32 0.01, %v4049_v50 }
 0x941   : > { %v4052_v13 = vsel %vm4050_vm5, %v4049_v50, %v4051_v7 }
 0x942   : > { %v4090_v14 = vrot.slane %v4052_v13, %v4089_v51  ;;  %v4094_v19 = vrot.slane %v4052_v13, %v4093_v3 }
 0x944   : > { %4161 = vmatprep.mubr.f32.mxu1 %v4094_v19 }
 0x945   : > { %4162 = vmatmul.mubr.f32.vlgmr.msra.gmra.mrb[44].mxu1 %v4090_v14 }
 0xa18   : > { %v5159_v20 = vpop.f32.mrb[44].mxu1 }
 0xa19   : > { %v5160_v28 = vpop.f32.mrb[45].mxu1 }
 0xa1a   : > { %v5161_v34 = vadd.f32 %v5160_v28, %v5159_v20 }
 0xa1c   : > { %v4164_v39 = vadd.f32 %v5161_v34, %v4085_v33 }
 0xa1e   : > { %v4168_v26 = vsel %vm4167_vm6, %v4164_v39, -inf }
 0xa1f   : > { %4169 = vmax.xlane.f32.xlu0 %v4168_v26 }
 0xaac   : > { %v4170_v40 = vpop.xlane.xlu0 %4169 }
 0xaad   : > { %v4171_v45 = vsub.f32 %v4164_v39, %v4170_v40 }
 0xaaf   : > { %v4172_v46 = vmul.f32 1.442695, %v4171_v45 }
 0xab1   : > { %6025 = vpow2.f32 %v4172_v46 }
 0xabb   : > { %v6026_v49 = vpop.eup %6025 }
 0xabc   : > { %v4174_v52 = vsel %vm4167_vm6, %v6026_v49, 0.0 }
 0xabd   : > { %4175 = vadd.xlane.f32.xlu0 %v4174_v52 }
 0xb4a   : > { %v4176_v53 = vpop.xlane.xlu0 %4175 }
 0xb4b   : > { %6027 = vrcp.f32 %v4176_v53 }
 0xb55   : > { %v6028_v54 = vpop.eup %6027 }
 0xb56   : > { %v4178_v30 = vmul.f32 %v6028_v54, %v6026_v49 }
 0xb58   : > { %4179 = vst.msk [vmem:[%s324_s23] sm:$0x1] %vm4167_vm6, %v4178_v30 }
 0xb59   : > { %6043 = shalt.err (!%p6040_p3)
}
 0xb5a   : > { %s6044_s21 = scalar_lea.hbm %s7202_s29, 16  ;;  %s6048_s23 = scalar_lea.hbm %s7254_s9, 32 }
 0xb5b   : > { %p6045_p4 = scmp.ne.s32.totalorder %s7202_s29, %s6044_s21  ;;  %p6049_p9 = scmp.lt.u32.totalorder %s7202_s29, %s7254_s9 }
 0xb5c   : > { %p6050_p10 = scmp.lt.u32.totalorder %s6048_s23, %s6044_s21  ;;  %p6052_p12 = scmp.lt.u32.totalorder %s6044_s21, %s7202_s29 }
 0xb5d   : > { %p6046_p7 = pnand %p6045_p4, %p6185_p5 }
 0xb5e   : > { %p6051_p11 = por %p6050_p10, %p6049_p9 }
 0xb5f   : > { %p6047_p8 = pneg %p6046_p7 }
 0xb60   : > { %p6053_p13 = por %p6052_p12, %p6051_p11 }
 0xb62   : > { %p6054_p0 = pnand %p6053_p13, %p6047_p8 }
 0xb64   : > { %6057 = shalt.err (!%p6054_p0)
}
 0xb65   : > { %5984 = dma.vmem_to_hbm [thread:$0]  (%p6185_p5), %s7204_s24, 16, %s7202_s29, %s4181_s27  }
 0xb66 PF: > { %p5990_p1 = scmp.ge.s32.totalorder %s6092_s12, 2  ;;  %s4205_s28 = sand.u32 1, %s6080_s30  }
 0xb67   : > { %s4206_s13 = scalar_lea.sflag [#allocation3], %s4205_s28 }
 0xb68   : > { %p5987_p2 = pnand %p5990_p1, %p6189_p6 }
 0xb6a   : > { %6075 = dma.done.wait (!%p5987_p2), %s4206_s13, 16  }
 0xb6b   : > { %6077 = vsyncadd (!%p5987_p2), %s4206_s13, 4294967280  ;;  %p19_p3 = scmp.ge.s32.totalorder %s6172_s15, 4   ;;  %s7257_s30 = smov %s6084_s10 }
 0xb6c   : > { %s7258_s10 = smov %s6088_s11  ;;  %s7259_s11 = smov %s6183_s18 }
 0xb6d   : > { %s7260_s12 = smov %s6172_s15  ;;  %21 = sbr.rel (!%p19_p3) target bundleno = 3 (0x3), region = 129 }
 0xb74   :  { %4210 = vsyncpa [#allocation3], 1 }
 0xb75   :  { %4212 = vsyncpa [#allocation3 + $0x1], 1 }

</bundles_post_ra>
